<compile_context>
chip_gen: v5e
topology: v5e:2x2
jax: 0.10.0
libtpu: 0.0.40
codegen_flags: <defaults>
</compile_context>

<pallas_src>
import functools
import math

import jax
import jax.numpy as jnp
from jax.experimental import pallas as pl
from jax.experimental.pallas import tpu as pltpu

IN_CH = 20                     # tdnn_input_dim / num_data_channel
TDNN_OUT = 256
HIDDEN = 128                   # LSTM hidden size
BN_EPS = 1e-5
MATMUL_DTYPE = jnp.bfloat16    # MXU-native operand dtype (f32 accumulation)


# ------------------------------ fused kernel -------------------------------

def _fused_forward_kernel(xt_ref, w1_ref, b1_ref, w2_ref, b2_ref,
                          w3_ref, b3_ref, *rest, num_layers):
    """Entire TDNN_LSTM forward for BB batch elements (grid axis = batch blocks).

    rest = [lstm_w0, lstm_b0, ..., wc1, bc1, wc2, bc2, wc3, bc3,
            logit_ref, h_ref, c_ref]
    """
    lstm_refs = rest[:2 * num_layers]
    wc1_ref, bc1_ref, wc2_ref, bc2_ref, wc3_ref, bc3_ref = \
        rest[2 * num_layers:2 * num_layers + 6]
    logit_ref, h_ref, c_ref = rest[2 * num_layers + 6:]

    BB, T, _ = xt_ref.shape
    H = HIDDEN
    L1 = T - 1                 # frame1 output frames (context=2, dilation=1)
    L2 = L1 - 2 * 3            # frame2 output frames (context=4, dilation=2)

    # ---- TDNN stack + AdaptiveAvgPool1d(1), unrolled over the BB elements.
    pooled_rows = []
    for b in range(BB):
        x_bf = xt_ref[b]                                     # (T, 20) bf16 (pre-cast)

        # frame1: TDNN(20 -> 256) + folded eval-BN + ReLU (two accumulated taps).
        acc1 = jnp.dot(x_bf[0:L1, :], w1_ref[0],
                       preferred_element_type=jnp.float32)
        acc1 += jnp.dot(x_bf[1:1 + L1, :], w1_ref[1],
                        preferred_element_type=jnp.float32)
        h1 = jnp.maximum(acc1 + b1_ref[...], 0.0)            # (L1, 256) f32
        h1_bf = h1.astype(MATMUL_DTYPE)                      # single hoisted cast

        # frame2: TDNN(256 -> 256, context=4, dilation=2) as ONE weight-stationary
        # (L1,256)@(256,1024) matmul; tap j contributes the rows shifted by 2*j.
        s_wide = jnp.dot(h1_bf, w2_ref[...],
                         preferred_element_type=jnp.float32)  # (L1, 1024) f32
        acc2 = (s_wide[0:L2, 0:256]
                + s_wide[2:2 + L2, 256:512]
                + s_wide[4:4 + L2, 512:768]
                + s_wide[6:6 + L2, 768:1024])
        h2 = jnp.maximum(acc2 + b2_ref[...], 0.0)            # (L2, 256) f32

        # frame3: TDNN(context=1) + BN + ReLU, fused with the average pool.
        h3 = jnp.maximum(
            jnp.dot(h2.astype(MATMUL_DTYPE), w3_ref[...],
                    preferred_element_type=jnp.float32) + b3_ref[...], 0.0)
        pooled_rows.append(jnp.mean(h3, axis=0, keepdims=True))   # (1, 256) f32

    pooled = jnp.concatenate(pooled_rows, axis=0)            # (BB, 256) f32

    # ---- LSTM over a length-1 sequence from zero state, batched over BB:
    # gates = x @ W_ih^T + (b_ih + b_hh); W_hh term vanishes and the forget gate
    # is dead (c0 == 0), so weights were pre-sliced to the [i, g, o] 3H columns.
    inp = pooled
    for layer in range(num_layers):
        w_l = lstm_refs[2 * layer]                           # (in, 3H) bf16
        b_l = lstm_refs[2 * layer + 1]                       # (1, 3H)  f32
        gates = jnp.dot(inp.astype(MATMUL_DTYPE), w_l[...],
                        preferred_element_type=jnp.float32) + b_l[...]
        i_g = jax.nn.sigmoid(gates[:, 0:H])
        g_g = jnp.tanh(gates[:, H:2 * H])
        o_g = jax.nn.sigmoid(gates[:, 2 * H:3 * H])
        c = i_g * g_g                                        # f * c_prev == 0
        h = o_g * jnp.tanh(c)
        h_ref[:, layer, :] = h                               # lane-dense (BB, 128)
        c_ref[:, layer, :] = c
        inp = h                                              # inter-layer dropout: eval

    # ---- classifier: Linear(128,32)+Sigmoid -> Linear(32,32)+Sigmoid -> Linear(32,1)
    z = jax.nn.sigmoid(jnp.dot(inp.astype(MATMUL_DTYPE), wc1_ref[...],
                               preferred_element_type=jnp.float32) + bc1_ref[...])
    z = jax.nn.sigmoid(jnp.dot(z.astype(MATMUL_DTYPE), wc2_ref[...],
                               preferred_element_type=jnp.float32) + bc2_ref[...])
    logit = jnp.dot(z.astype(MATMUL_DTYPE), wc3_ref[...],
                    preferred_element_type=jnp.float32) + bc3_ref[...]
    logit_ref[...] = logit.reshape(BB, 1, 1)


# ------------------------------ params / fold -------------------------------

def init_params(key, num_layers):
    """Random parameters in a PyTorch-like layout (weights as (in, out))."""
    keys = jax.random.split(key, 8 + num_layers)

    def dense(k, in_dim, out_dim, scale=0.05):
        kw, kb = jax.random.split(k)
        w = jax.random.normal(kw, (in_dim, out_dim), jnp.float32) * scale
        b = jax.random.normal(kb, (out_dim,), jnp.float32) * scale
        return w, b

    raw = {
        "frame1": dense(keys[0], IN_CH * 2, TDNN_OUT),       # context=2, dil=1
        "frame2": dense(keys[1], TDNN_OUT * 4, TDNN_OUT),    # context=4, dil=2
        "frame3": dense(keys[2], TDNN_OUT * 1, TDNN_OUT),    # context=1, dil=1
        "cls1": dense(keys[3], HIDDEN, 32),
        "cls2": dense(keys[4], 32, 32),
        "cls3": dense(keys[5], 32, 1),
    }
    lstm = []
    for layer in range(num_layers):
        in_dim = TDNN_OUT if layer == 0 else HIDDEN
        w_ih_t, b_ih = dense(keys[6 + layer], in_dim, 4 * HIDDEN)
        b_hh = jax.random.normal(jax.random.fold_in(keys[6 + layer], 7),
                                 (4 * HIDDEN,), jnp.float32) * 0.05
        # TODO(synk): W_hh is irrelevant for a length-1 sequence from zero
        # initial state, so it is neither generated nor used.
        lstm.append((w_ih_t, b_ih, b_hh))
    raw["lstm"] = lstm
    return raw


def fold_params(raw):
    """Host-side folds so the kernel does no redundant work.

    General eval-BN fold (use this for a real checkpoint):
        s  = gamma / sqrt(running_var + eps)
        w' = w * s          b' = (b - running_mu) * s + beta
    Untrained defaults (mu=0, var=1, gamma=1, beta=0) give the scalar
    s = 1/sqrt(1+eps), so it commutes with all the reshapes below.
    frame1 weights -> (2, 20, 256) tap slices; frame2 tap weights are
    concatenated along the output axis into one (256, 1024) matrix so the
    kernel runs a single weight-stationary matmul.  All GEMM weights are
    bf16 (MXU-native); biases stay f32.  LSTM weights/biases are pre-sliced
    to the live [i, g, o] gates (seq_len==1, zero initial state).
    """
    s = 1.0 / math.sqrt(1.0 + BN_EPS)
    p = {}

    w1, b1 = raw["frame1"]                                    # (40, 256)
    p["frame1"] = ((w1 * s).astype(MATMUL_DTYPE).reshape(2, IN_CH, TDNN_OUT),
                   (b1 * s).reshape(1, -1))

    w2, b2 = raw["frame2"]                                    # (1024, 256)
    w2_taps = (w2 * s).reshape(4, TDNN_OUT, TDNN_OUT)         # (tap, in, out)
    w2_wide = jnp.concatenate([w2_taps[j] for j in range(4)], axis=1)  # (256, 1024)
    p["frame2"] = (w2_wide.astype(MATMUL_DTYPE), (b2 * s).reshape(1, -1))

    w3, b3 = raw["frame3"]                                    # (256, 256)
    p["frame3"] = ((w3 * s).astype(MATMUL_DTYPE), (b3 * s).reshape(1, -1))

    for name in ("cls1", "cls2", "cls3"):
        w, b = raw[name]
        p[name] = (w.astype(MATMUL_DTYPE), b.reshape(1, -1))

    H = HIDDEN
    lstm = []
    for w_ih_t, b_ih, b_hh in raw["lstm"]:
        b = b_ih + b_hh
        # PyTorch gate order [i, f, g, o]; forget gate dead since c0 == 0.
        w_igo = jnp.concatenate(
            [w_ih_t[:, 0:H], w_ih_t[:, 2 * H:3 * H], w_ih_t[:, 3 * H:4 * H]], axis=1)
        b_igo = jnp.concatenate(
            [b[0:H], b[2 * H:3 * H], b[3 * H:4 * H]]).reshape(1, -1)
        lstm.append((w_igo.astype(MATMUL_DTYPE), b_igo))
    p["lstm"] = lstm
    return p


# --------------------------------- forward ----------------------------------

def _pick_block_batch(B):
    """BB elements per grid step: amortize ~0.35 us/step overhead, but keep the
    grid >= 2 steps when B >= 2 so both v7x TensorCores get work."""
    if B <= 1:
        return 1
    return max(1, min(8, B // 2))


def tdnn_lstm_forward(params, x, *, num_layers):
    """x: (B, 20, T) -> (logit (B, 1), hidden=(h_n, c_n) each (num_layers, B, 128))."""
    B, C, T = x.shape
    assert C == IN_CH and T >= 8, "need T >= 8 so every TDNN layer has output frames"

    # x.unsqueeze(1); x[:, 0].permute(0, 2, 1) -> (B, T, 20); pre-cast to bf16
    # (the kernel's matmuls truncate to bf16 anyway) -> halves the input DMA.
    xt = jnp.transpose(x, (0, 2, 1)).astype(MATMUL_DTYPE)

    BB = _pick_block_batch(B)
    nb = pl.cdiv(B, BB)
    B_pad = nb * BB
    if B_pad != B:
        xt = jnp.pad(xt, ((0, B_pad - B), (0, 0), (0, 0)))

    operands = [xt, *params["frame1"], *params["frame2"], *params["frame3"]]
    for w_l, b_l in params["lstm"]:
        operands += [w_l, b_l]
    operands += [*params["cls1"], *params["cls2"], *params["cls3"]]

    def resident(arr):   # same block every step -> Pallas keeps it in VMEM
        zeros = (0,) * arr.ndim
        return pl.BlockSpec(arr.shape, lambda i, _z=zeros: _z)

    in_specs = [pl.BlockSpec((BB, T, C), lambda i: (i, 0, 0))]
    in_specs += [resident(op) for op in operands[1:]]

    out_shape = (
        jax.ShapeDtypeStruct((B_pad, 1, 1), jnp.float32),                  # logit
        jax.ShapeDtypeStruct((B_pad, num_layers, HIDDEN), jnp.float32),    # h_n
        jax.ShapeDtypeStruct((B_pad, num_layers, HIDDEN), jnp.float32),    # c_n
    )
    out_specs = (
        pl.BlockSpec((BB, 1, 1), lambda i: (i, 0, 0)),
        pl.BlockSpec((BB, num_layers, HIDDEN), lambda i: (i, 0, 0)),
        pl.BlockSpec((BB, num_layers, HIDDEN), lambda i: (i, 0, 0)),
    )

    logit3, h_bnl, c_bnl = pl.pallas_call(
        functools.partial(_fused_forward_kernel, num_layers=num_layers),
        out_shape=out_shape,
        grid=(nb,),
        in_specs=in_specs,
        out_specs=out_specs,
        compiler_params=pltpu.CompilerParams(
            dimension_semantics=("parallel",),      # batch blocks shard across TCs
            vmem_limit_bytes=32 * 1024 * 1024),     # explicit guard (safe on v5e-v7x)
    )(*operands)

    logit = logit3[:B].reshape(B, 1)
    hidden = (jnp.transpose(h_bnl[:B], (1, 0, 2)),
              jnp.transpose(c_bnl[:B], (1, 0, 2)))
    return logit, hidden


if __name__ == "__main__":
    args = {"num_layers": 2, "dropout": 0.0, "batch_size": 2}
    B, C, T = args["batch_size"], IN_CH, 32   # module nominal T=200; small demo T

    key = jax.random.PRNGKey(0)
    pkey, xkey = jax.random.split(key)
    params = fold_params(init_params(pkey, args["num_layers"]))
    x = jax.random.normal(xkey, (B, C, T), jnp.float32)

    fwd = jax.jit(functools.partial(tdnn_lstm_forward,
                                    num_layers=args["num_layers"]))
    logit, hidden = fwd(params, x)
    jax.block_until_ready((logit, hidden))

    assert logit.shape == (B, 1)
    assert hidden[0].shape == (args["num_layers"], B, HIDDEN)
    assert hidden[1].shape == (args["num_layers"], B, HIDDEN)
    print("KERNEL_OK")
</pallas_src>

<mosaic_0001>
module attributes {stable_mosaic.version = 11 : i64} {
  func.func @_fused_forward_kernel(%arg0: i32, %arg1: memref<1x32x20xbf16, #tpu.memory_space<vmem>>, %arg2: memref<2x20x256xbf16, #tpu.memory_space<vmem>>, %arg3: memref<1x256xf32, #tpu.memory_space<vmem>>, %arg4: memref<256x1024xbf16, #tpu.memory_space<vmem>>, %arg5: memref<1x256xf32, #tpu.memory_space<vmem>>, %arg6: memref<256x256xbf16, #tpu.memory_space<vmem>>, %arg7: memref<1x256xf32, #tpu.memory_space<vmem>>, %arg8: memref<256x384xbf16, #tpu.memory_space<vmem>>, %arg9: memref<1x384xf32, #tpu.memory_space<vmem>>, %arg10: memref<128x384xbf16, #tpu.memory_space<vmem>>, %arg11: memref<1x384xf32, #tpu.memory_space<vmem>>, %arg12: memref<128x32xbf16, #tpu.memory_space<vmem>>, %arg13: memref<1x32xf32, #tpu.memory_space<vmem>>, %arg14: memref<32x32xbf16, #tpu.memory_space<vmem>>, %arg15: memref<1x32xf32, #tpu.memory_space<vmem>>, %arg16: memref<32x1xbf16, #tpu.memory_space<vmem>>, %arg17: memref<1x1xf32, #tpu.memory_space<vmem>>, %arg18: memref<1x1x1xf32, #tpu.memory_space<vmem>>, %arg19: memref<1x2x128xf32, #tpu.memory_space<vmem>>, %arg20: memref<1x2x128xf32, #tpu.memory_space<vmem>>) attributes {dimension_semantics = [#tpu.dimension_semantics<parallel>], iteration_bounds = array<i64: 2>, scalar_prefetch = 0 : i64, scratch_operands = 0 : i64, tpu.core_type = #tpu.core_type<tc>, window_params = [{transform_indices = @transform_0, window_bounds = array<i64: 1, 32, 20>}, {pipeline_mode = #tpu.pipeline_mode<synchronous>, transform_indices = @transform_1, window_bounds = array<i64: 2, 20, 256>}, {pipeline_mode = #tpu.pipeline_mode<synchronous>, transform_indices = @transform_2, window_bounds = array<i64: 1, 256>}, {pipeline_mode = #tpu.pipeline_mode<synchronous>, transform_indices = @transform_3, window_bounds = array<i64: 256, 1024>}, {pipeline_mode = #tpu.pipeline_mode<synchronous>, transform_indices = @transform_4, window_bounds = array<i64: 1, 256>}, {pipeline_mode = #tpu.pipeline_mode<synchronous>, transform_indices = @transform_5, window_bounds = array<i64: 256, 256>}, {pipeline_mode = #tpu.pipeline_mode<synchronous>, transform_indices = @transform_6, window_bounds = array<i64: 1, 256>}, {pipeline_mode = #tpu.pipeline_mode<synchronous>, transform_indices = @transform_7, window_bounds = array<i64: 256, 384>}, {pipeline_mode = #tpu.pipeline_mode<synchronous>, transform_indices = @transform_8, window_bounds = array<i64: 1, 384>}, {pipeline_mode = #tpu.pipeline_mode<synchronous>, transform_indices = @transform_9, window_bounds = array<i64: 128, 384>}, {pipeline_mode = #tpu.pipeline_mode<synchronous>, transform_indices = @transform_10, window_bounds = array<i64: 1, 384>}, {pipeline_mode = #tpu.pipeline_mode<synchronous>, transform_indices = @transform_11, window_bounds = array<i64: 128, 32>}, {pipeline_mode = #tpu.pipeline_mode<synchronous>, transform_indices = @transform_12, window_bounds = array<i64: 1, 32>}, {pipeline_mode = #tpu.pipeline_mode<synchronous>, transform_indices = @transform_13, window_bounds = array<i64: 32, 32>}, {pipeline_mode = #tpu.pipeline_mode<synchronous>, transform_indices = @transform_14, window_bounds = array<i64: 1, 32>}, {pipeline_mode = #tpu.pipeline_mode<synchronous>, transform_indices = @transform_15, window_bounds = array<i64: 32, 1>}, {pipeline_mode = #tpu.pipeline_mode<synchronous>, transform_indices = @transform_16, window_bounds = array<i64: 1, 1>}, {transform_indices = @transform_17, window_bounds = array<i64: 1, 1, 1>}, {transform_indices = @transform_18, window_bounds = array<i64: 1, 2, 128>}, {transform_indices = @transform_19, window_bounds = array<i64: 1, 2, 128>}]} {
    %c0 = arith.constant 0 : index
    %c0_0 = arith.constant 0 : index
    %c0_1 = arith.constant 0 : index
    %0 = vector.load %arg1[%c0, %c0_0, %c0_1] : memref<1x32x20xbf16, #tpu.memory_space<vmem>>, vector<1x32x20xbf16>
    %1 = vector.shape_cast %0 : vector<1x32x20xbf16> to vector<32x20xbf16>
    %2 = vector.extract_strided_slice %1 {offsets = [0, 0], sizes = [31, 20], strides = [1, 1]} : vector<32x20xbf16> to vector<31x20xbf16>
    %c0_2 = arith.constant 0 : index
    %c0_3 = arith.constant 0 : index
    %c0_4 = arith.constant 0 : index
    %3 = vector.load %arg2[%c0_2, %c0_3, %c0_4] : memref<2x20x256xbf16, #tpu.memory_space<vmem>>, vector<1x20x256xbf16>
    %4 = vector.shape_cast %3 : vector<1x20x256xbf16> to vector<20x256xbf16>
    %cst = arith.constant dense<0.000000e+00> : vector<31x256xf32>
    %5 = tpu.matmul %2, %4, %cst {dimension_numbers = #tpu.dot_dimension_numbers<[1], [0], [0], [1], [0, 0, 1, 1], [], []>} : vector<31x20xbf16>, vector<20x256xbf16>, vector<31x256xf32> -> vector<31x256xf32>
    %6 = vector.extract_strided_slice %1 {offsets = [1, 0], sizes = [31, 20], strides = [1, 1]} : vector<32x20xbf16> to vector<31x20xbf16>
    %c1 = arith.constant 1 : index
    %c0_5 = arith.constant 0 : index
    %c0_6 = arith.constant 0 : index
    %7 = vector.load %arg2[%c1, %c0_5, %c0_6] : memref<2x20x256xbf16, #tpu.memory_space<vmem>>, vector<1x20x256xbf16>
    %8 = vector.shape_cast %7 : vector<1x20x256xbf16> to vector<20x256xbf16>
    %cst_7 = arith.constant dense<0.000000e+00> : vector<31x256xf32>
    %9 = tpu.matmul %6, %8, %cst_7 {dimension_numbers = #tpu.dot_dimension_numbers<[1], [0], [0], [1], [0, 0, 1, 1], [], []>} : vector<31x20xbf16>, vector<20x256xbf16>, vector<31x256xf32> -> vector<31x256xf32>
    %10 = arith.addf %5, %9 : vector<31x256xf32>
    %c0_8 = arith.constant 0 : index
    %c0_9 = arith.constant 0 : index
    %11 = vector.load %arg3[%c0_8, %c0_9] : memref<1x256xf32, #tpu.memory_space<vmem>>, vector<1x256xf32>
    %12 = vector.broadcast %11 : vector<1x256xf32> to vector<31x256xf32>
    %13 = arith.addf %10, %12 : vector<31x256xf32>
    %cst_10 = arith.constant 0.000000e+00 : f32
    %14 = vector.broadcast %cst_10 : f32 to vector<31x256xf32>
    %15 = arith.maximumf %13, %14 : vector<31x256xf32>
    %16 = arith.truncf %15 : vector<31x256xf32> to vector<31x256xbf16>
    %c0_11 = arith.constant 0 : index
    %c0_12 = arith.constant 0 : index
    %17 = vector.load %arg4[%c0_11, %c0_12] : memref<256x1024xbf16, #tpu.memory_space<vmem>>, vector<256x1024xbf16>
    %cst_13 = arith.constant dense<0.000000e+00> : vector<31x1024xf32>
    %18 = tpu.matmul %16, %17, %cst_13 {dimension_numbers = #tpu.dot_dimension_numbers<[1], [0], [0], [1], [0, 0, 1, 1], [], []>} : vector<31x256xbf16>, vector<256x1024xbf16>, vector<31x1024xf32> -> vector<31x1024xf32>
    %19 = vector.extract_strided_slice %18 {offsets = [0, 0], sizes = [25, 256], strides = [1, 1]} : vector<31x1024xf32> to vector<25x256xf32>
    %20 = vector.extract_strided_slice %18 {offsets = [2, 256], sizes = [25, 256], strides = [1, 1]} : vector<31x1024xf32> to vector<25x256xf32>
    %21 = arith.addf %19, %20 : vector<25x256xf32>
    %22 = vector.extract_strided_slice %18 {offsets = [4, 512], sizes = [25, 256], strides = [1, 1]} : vector<31x1024xf32> to vector<25x256xf32>
    %23 = arith.addf %21, %22 : vector<25x256xf32>
    %24 = vector.extract_strided_slice %18 {offsets = [6, 768], sizes = [25, 256], strides = [1, 1]} : vector<31x1024xf32> to vector<25x256xf32>
    %25 = arith.addf %23, %24 : vector<25x256xf32>
    %c0_14 = arith.constant 0 : index
    %c0_15 = arith.constant 0 : index
    %26 = vector.load %arg5[%c0_14, %c0_15] : memref<1x256xf32, #tpu.memory_space<vmem>>, vector<1x256xf32>
    %27 = vector.broadcast %26 : vector<1x256xf32> to vector<25x256xf32>
    %28 = arith.addf %25, %27 : vector<25x256xf32>
    %cst_16 = arith.constant 0.000000e+00 : f32
    %29 = vector.broadcast %cst_16 : f32 to vector<25x256xf32>
    %30 = arith.maximumf %28, %29 : vector<25x256xf32>
    %31 = arith.truncf %30 : vector<25x256xf32> to vector<25x256xbf16>
    %c0_17 = arith.constant 0 : index
    %c0_18 = arith.constant 0 : index
    %32 = vector.load %arg6[%c0_17, %c0_18] : memref<256x256xbf16, #tpu.memory_space<vmem>>, vector<256x256xbf16>
    %cst_19 = arith.constant dense<0.000000e+00> : vector<25x256xf32>
    %33 = tpu.matmul %31, %32, %cst_19 {dimension_numbers = #tpu.dot_dimension_numbers<[1], [0], [0], [1], [0, 0, 1, 1], [], []>} : vector<25x256xbf16>, vector<256x256xbf16>, vector<25x256xf32> -> vector<25x256xf32>
    %c0_20 = arith.constant 0 : index
    %c0_21 = arith.constant 0 : index
    %34 = vector.load %arg7[%c0_20, %c0_21] : memref<1x256xf32, #tpu.memory_space<vmem>>, vector<1x256xf32>
    %35 = vector.broadcast %34 : vector<1x256xf32> to vector<25x256xf32>
    %36 = arith.addf %33, %35 : vector<25x256xf32>
    %cst_22 = arith.constant 0.000000e+00 : f32
    %37 = vector.broadcast %cst_22 : f32 to vector<25x256xf32>
    %38 = arith.maximumf %36, %37 : vector<25x256xf32>
    %cst_23 = arith.constant dense<0.000000e+00> : vector<256xf32>
    %39 = vector.multi_reduction <add>, %38, %cst_23 [0] : vector<25x256xf32> to vector<256xf32>
    %40 = vector.shape_cast %39 : vector<256xf32> to vector<1x256xf32>
    %cst_24 = arith.constant 2.500000e+01 : f32
    %41 = vector.broadcast %cst_24 : f32 to vector<1x256xf32>
    %42 = arith.divf %40, %41 : vector<1x256xf32>
    %43 = arith.truncf %42 : vector<1x256xf32> to vector<1x256xbf16>
    %c0_25 = arith.constant 0 : index
    %c0_26 = arith.constant 0 : index
    %44 = vector.load %arg8[%c0_25, %c0_26] : memref<256x384xbf16, #tpu.memory_space<vmem>>, vector<256x384xbf16>
    %cst_27 = arith.constant dense<0.000000e+00> : vector<1x384xf32>
    %45 = tpu.matmul %43, %44, %cst_27 {dimension_numbers = #tpu.dot_dimension_numbers<[1], [0], [0], [1], [0, 0, 1, 1], [], []>} : vector<1x256xbf16>, vector<256x384xbf16>, vector<1x384xf32> -> vector<1x384xf32>
    %c0_28 = arith.constant 0 : index
    %c0_29 = arith.constant 0 : index
    %46 = vector.load %arg9[%c0_28, %c0_29] : memref<1x384xf32, #tpu.memory_space<vmem>>, vector<1x384xf32>
    %47 = arith.addf %45, %46 : vector<1x384xf32>
    %48 = vector.extract_strided_slice %47 {offsets = [0, 0], sizes = [1, 128], strides = [1, 1]} : vector<1x384xf32> to vector<1x128xf32>
    %49 = arith.negf %48 : vector<1x128xf32>
    %50 = math.exp %49 : vector<1x128xf32>
    %cst_30 = arith.constant 1.000000e+00 : f32
    %51 = vector.broadcast %cst_30 : f32 to vector<1x128xf32>
    %52 = arith.addf %51, %50 : vector<1x128xf32>
    %53 = arith.divf %51, %52 : vector<1x128xf32>
    %54 = vector.extract_strided_slice %47 {offsets = [0, 128], sizes = [1, 128], strides = [1, 1]} : vector<1x384xf32> to vector<1x128xf32>
    %55 = math.tanh %54 : vector<1x128xf32>
    %56 = vector.extract_strided_slice %47 {offsets = [0, 256], sizes = [1, 128], strides = [1, 1]} : vector<1x384xf32> to vector<1x128xf32>
    %57 = arith.negf %56 : vector<1x128xf32>
    %58 = math.exp %57 : vector<1x128xf32>
    %cst_31 = arith.constant 1.000000e+00 : f32
    %59 = vector.broadcast %cst_31 : f32 to vector<1x128xf32>
    %60 = arith.addf %59, %58 : vector<1x128xf32>
    %61 = arith.divf %59, %60 : vector<1x128xf32>
    %62 = arith.mulf %53, %55 : vector<1x128xf32>
    %63 = math.tanh %62 : vector<1x128xf32>
    %64 = arith.mulf %61, %63 : vector<1x128xf32>
    %c0_32 = arith.constant 0 : index
    %c0_33 = arith.constant 0 : index
    %c0_34 = arith.constant 0 : index
    %65 = vector.load %arg19[%c0_32, %c0_33, %c0_34] : memref<1x2x128xf32, #tpu.memory_space<vmem>>, vector<1x1x128xf32>
    %66 = vector.shape_cast %65 : vector<1x1x128xf32> to vector<1x128xf32>
    %67 = vector.shape_cast %64 : vector<1x128xf32> to vector<1x1x128xf32>
    tpu.vector_store %arg19[%c0_32, %c0_33, %c0_34], %67 {strides = array<i32>} : memref<1x2x128xf32, #tpu.memory_space<vmem>>, vector<1x1x128xf32>,
    %c0_35 = arith.constant 0 : index
    %c0_36 = arith.constant 0 : index
    %c0_37 = arith.constant 0 : index
    %68 = vector.load %arg20[%c0_35, %c0_36, %c0_37] : memref<1x2x128xf32, #tpu.memory_space<vmem>>, vector<1x1x128xf32>
    %69 = vector.shape_cast %68 : vector<1x1x128xf32> to vector<1x128xf32>
    %70 = vector.shape_cast %62 : vector<1x128xf32> to vector<1x1x128xf32>
    tpu.vector_store %arg20[%c0_35, %c0_36, %c0_37], %70 {strides = array<i32>} : memref<1x2x128xf32, #tpu.memory_space<vmem>>, vector<1x1x128xf32>,
    %71 = arith.truncf %64 : vector<1x128xf32> to vector<1x128xbf16>
    %c0_38 = arith.constant 0 : index
    %c0_39 = arith.constant 0 : index
    %72 = vector.load %arg10[%c0_38, %c0_39] : memref<128x384xbf16, #tpu.memory_space<vmem>>, vector<128x384xbf16>
    %cst_40 = arith.constant dense<0.000000e+00> : vector<1x384xf32>
    %73 = tpu.matmul %71, %72, %cst_40 {dimension_numbers = #tpu.dot_dimension_numbers<[1], [0], [0], [1], [0, 0, 1, 1], [], []>} : vector<1x128xbf16>, vector<128x384xbf16>, vector<1x384xf32> -> vector<1x384xf32>
    %c0_41 = arith.constant 0 : index
    %c0_42 = arith.constant 0 : index
    %74 = vector.load %arg11[%c0_41, %c0_42] : memref<1x384xf32, #tpu.memory_space<vmem>>, vector<1x384xf32>
    %75 = arith.addf %73, %74 : vector<1x384xf32>
    %76 = vector.extract_strided_slice %75 {offsets = [0, 0], sizes = [1, 128], strides = [1, 1]} : vector<1x384xf32> to vector<1x128xf32>
    %77 = arith.negf %76 : vector<1x128xf32>
    %78 = math.exp %77 : vector<1x128xf32>
    %cst_43 = arith.constant 1.000000e+00 : f32
    %79 = vector.broadcast %cst_43 : f32 to vector<1x128xf32>
    %80 = arith.addf %79, %78 : vector<1x128xf32>
    %81 = arith.divf %79, %80 : vector<1x128xf32>
    %82 = vector.extract_strided_slice %75 {offsets = [0, 128], sizes = [1, 128], strides = [1, 1]} : vector<1x384xf32> to vector<1x128xf32>
    %83 = math.tanh %82 : vector<1x128xf32>
    %84 = vector.extract_strided_slice %75 {offsets = [0, 256], sizes = [1, 128], strides = [1, 1]} : vector<1x384xf32> to vector<1x128xf32>
    %85 = arith.negf %84 : vector<1x128xf32>
    %86 = math.exp %85 : vector<1x128xf32>
    %cst_44 = arith.constant 1.000000e+00 : f32
    %87 = vector.broadcast %cst_44 : f32 to vector<1x128xf32>
    %88 = arith.addf %87, %86 : vector<1x128xf32>
    %89 = arith.divf %87, %88 : vector<1x128xf32>
    %90 = arith.mulf %81, %83 : vector<1x128xf32>
    %91 = math.tanh %90 : vector<1x128xf32>
    %92 = arith.mulf %89, %91 : vector<1x128xf32>
    %c0_45 = arith.constant 0 : index
    %c1_46 = arith.constant 1 : index
    %c0_47 = arith.constant 0 : index
    %93 = vector.load %arg19[%c0_45, %c1_46, %c0_47] : memref<1x2x128xf32, #tpu.memory_space<vmem>>, vector<1x1x128xf32>
    %94 = vector.shape_cast %93 : vector<1x1x128xf32> to vector<1x128xf32>
    %95 = vector.shape_cast %92 : vector<1x128xf32> to vector<1x1x128xf32>
    tpu.vector_store %arg19[%c0_45, %c1_46, %c0_47], %95 {strides = array<i32>} : memref<1x2x128xf32, #tpu.memory_space<vmem>>, vector<1x1x128xf32>,
    %c0_48 = arith.constant 0 : index
    %c1_49 = arith.constant 1 : index
    %c0_50 = arith.constant 0 : index
    %96 = vector.load %arg20[%c0_48, %c1_49, %c0_50] : memref<1x2x128xf32, #tpu.memory_space<vmem>>, vector<1x1x128xf32>
    %97 = vector.shape_cast %96 : vector<1x1x128xf32> to vector<1x128xf32>
    %98 = vector.shape_cast %90 : vector<1x128xf32> to vector<1x1x128xf32>
    tpu.vector_store %arg20[%c0_48, %c1_49, %c0_50], %98 {strides = array<i32>} : memref<1x2x128xf32, #tpu.memory_space<vmem>>, vector<1x1x128xf32>,
    %99 = arith.truncf %92 : vector<1x128xf32> to vector<1x128xbf16>
    %c0_51 = arith.constant 0 : index
    %c0_52 = arith.constant 0 : index
    %100 = vector.load %arg12[%c0_51, %c0_52] : memref<128x32xbf16, #tpu.memory_space<vmem>>, vector<128x32xbf16>
    %cst_53 = arith.constant dense<0.000000e+00> : vector<1x32xf32>
    %101 = tpu.matmul %99, %100, %cst_53 {dimension_numbers = #tpu.dot_dimension_numbers<[1], [0], [0], [1], [0, 0, 1, 1], [], []>} : vector<1x128xbf16>, vector<128x32xbf16>, vector<1x32xf32> -> vector<1x32xf32>
    %c0_54 = arith.constant 0 : index
    %c0_55 = arith.constant 0 : index
    %102 = vector.load %arg13[%c0_54, %c0_55] : memref<1x32xf32, #tpu.memory_space<vmem>>, vector<1x32xf32>
    %103 = arith.addf %101, %102 : vector<1x32xf32>
    %104 = arith.negf %103 : vector<1x32xf32>
    %105 = math.exp %104 : vector<1x32xf32>
    %cst_56 = arith.constant 1.000000e+00 : f32
    %106 = vector.broadcast %cst_56 : f32 to vector<1x32xf32>
    %107 = arith.addf %106, %105 : vector<1x32xf32>
    %108 = arith.divf %106, %107 : vector<1x32xf32>
    %109 = arith.truncf %108 : vector<1x32xf32> to vector<1x32xbf16>
    %c0_57 = arith.constant 0 : index
    %c0_58 = arith.constant 0 : index
    %110 = vector.load %arg14[%c0_57, %c0_58] : memref<32x32xbf16, #tpu.memory_space<vmem>>, vector<32x32xbf16>
    %cst_59 = arith.constant dense<0.000000e+00> : vector<1x32xf32>
    %111 = tpu.matmul %109, %110, %cst_59 {dimension_numbers = #tpu.dot_dimension_numbers<[1], [0], [0], [1], [0, 0, 1, 1], [], []>} : vector<1x32xbf16>, vector<32x32xbf16>, vector<1x32xf32> -> vector<1x32xf32>
    %c0_60 = arith.constant 0 : index
    %c0_61 = arith.constant 0 : index
    %112 = vector.load %arg15[%c0_60, %c0_61] : memref<1x32xf32, #tpu.memory_space<vmem>>, vector<1x32xf32>
    %113 = arith.addf %111, %112 : vector<1x32xf32>
    %114 = arith.negf %113 : vector<1x32xf32>
    %115 = math.exp %114 : vector<1x32xf32>
    %cst_62 = arith.constant 1.000000e+00 : f32
    %116 = vector.broadcast %cst_62 : f32 to vector<1x32xf32>
    %117 = arith.addf %116, %115 : vector<1x32xf32>
    %118 = arith.divf %116, %117 : vector<1x32xf32>
    %119 = arith.truncf %118 : vector<1x32xf32> to vector<1x32xbf16>
    %c0_63 = arith.constant 0 : index
    %c0_64 = arith.constant 0 : index
    %120 = vector.load %arg16[%c0_63, %c0_64] : memref<32x1xbf16, #tpu.memory_space<vmem>>, vector<32x1xbf16>
    %cst_65 = arith.constant dense<0.000000e+00> : vector<1x1xf32>
    %121 = tpu.matmul %119, %120, %cst_65 {dimension_numbers = #tpu.dot_dimension_numbers<[1], [0], [0], [1], [0, 0, 1, 1], [], []>} : vector<1x32xbf16>, vector<32x1xbf16>, vector<1x1xf32> -> vector<1x1xf32>
    %c0_66 = arith.constant 0 : index
    %c0_67 = arith.constant 0 : index
    %122 = vector.load %arg17[%c0_66, %c0_67] : memref<1x1xf32, #tpu.memory_space<vmem>>, vector<1x1xf32>
    %123 = arith.addf %121, %122 : vector<1x1xf32>
    %124 = vector.shape_cast %123 : vector<1x1xf32> to vector<1x1x1xf32>
    %c0_68 = arith.constant 0 : index
    %c0_69 = arith.constant 0 : index
    %c0_70 = arith.constant 0 : index
    %125 = vector.load %arg18[%c0_68, %c0_69, %c0_70] : memref<1x1x1xf32, #tpu.memory_space<vmem>>, vector<1x1x1xf32>
    tpu.vector_store %arg18[%c0_68, %c0_69, %c0_70], %124 {strides = array<i32>} : memref<1x1x1xf32, #tpu.memory_space<vmem>>, vector<1x1x1xf32>,
    return
  }
  func.func @transform_0(%arg0: i32) -> (i32, i32, i32) {
    %c0_i32 = arith.constant 0 : i32
    %c0_i32_0 = arith.constant 0 : i32
    %c0_i32_1 = arith.constant 0 : i32
    return %arg0, %c0_i32, %c0_i32_0 : i32, i32, i32
  }
  func.func @transform_1(%arg0: i32) -> (i32, i32, i32) {
    %c0_i32 = arith.constant 0 : i32
    %c0_i32_0 = arith.constant 0 : i32
    %c0_i32_1 = arith.constant 0 : i32
    %c0_i32_2 = arith.constant 0 : i32
    return %c0_i32, %c0_i32_0, %c0_i32_1 : i32, i32, i32
  }
  func.func @transform_2(%arg0: i32) -> (i32, i32) {
    %c0_i32 = arith.constant 0 : i32
    %c0_i32_0 = arith.constant 0 : i32
    %c0_i32_1 = arith.constant 0 : i32
    return %c0_i32, %c0_i32_0 : i32, i32
  }
  func.func @transform_3(%arg0: i32) -> (i32, i32) {
    %c0_i32 = arith.constant 0 : i32
    %c0_i32_0 = arith.constant 0 : i32
    %c0_i32_1 = arith.constant 0 : i32
    return %c0_i32, %c0_i32_0 : i32, i32
  }
  func.func @transform_4(%arg0: i32) -> (i32, i32) {
    %c0_i32 = arith.constant 0 : i32
    %c0_i32_0 = arith.constant 0 : i32
    %c0_i32_1 = arith.constant 0 : i32
    return %c0_i32, %c0_i32_0 : i32, i32
  }
  func.func @transform_5(%arg0: i32) -> (i32, i32) {
    %c0_i32 = arith.constant 0 : i32
    %c0_i32_0 = arith.constant 0 : i32
    %c0_i32_1 = arith.constant 0 : i32
    return %c0_i32, %c0_i32_0 : i32, i32
  }
  func.func @transform_6(%arg0: i32) -> (i32, i32) {
    %c0_i32 = arith.constant 0 : i32
    %c0_i32_0 = arith.constant 0 : i32
    %c0_i32_1 = arith.constant 0 : i32
    return %c0_i32, %c0_i32_0 : i32, i32
  }
  func.func @transform_7(%arg0: i32) -> (i32, i32) {
    %c0_i32 = arith.constant 0 : i32
    %c0_i32_0 = arith.constant 0 : i32
    %c0_i32_1 = arith.constant 0 : i32
    return %c0_i32, %c0_i32_0 : i32, i32
  }
  func.func @transform_8(%arg0: i32) -> (i32, i32) {
    %c0_i32 = arith.constant 0 : i32
    %c0_i32_0 = arith.constant 0 : i32
    %c0_i32_1 = arith.constant 0 : i32
    return %c0_i32, %c0_i32_0 : i32, i32
  }
  func.func @transform_9(%arg0: i32) -> (i32, i32) {
    %c0_i32 = arith.constant 0 : i32
    %c0_i32_0 = arith.constant 0 : i32
    %c0_i32_1 = arith.constant 0 : i32
    return %c0_i32, %c0_i32_0 : i32, i32
  }
  func.func @transform_10(%arg0: i32) -> (i32, i32) {
    %c0_i32 = arith.constant 0 : i32
    %c0_i32_0 = arith.constant 0 : i32
    %c0_i32_1 = arith.constant 0 : i32
    return %c0_i32, %c0_i32_0 : i32, i32
  }
  func.func @transform_11(%arg0: i32) -> (i32, i32) {
    %c0_i32 = arith.constant 0 : i32
    %c0_i32_0 = arith.constant 0 : i32
    %c0_i32_1 = arith.constant 0 : i32
    return %c0_i32, %c0_i32_0 : i32, i32
  }
  func.func @transform_12(%arg0: i32) -> (i32, i32) {
    %c0_i32 = arith.constant 0 : i32
    %c0_i32_0 = arith.constant 0 : i32
    %c0_i32_1 = arith.constant 0 : i32
    return %c0_i32, %c0_i32_0 : i32, i32
  }
  func.func @transform_13(%arg0: i32) -> (i32, i32) {
    %c0_i32 = arith.constant 0 : i32
    %c0_i32_0 = arith.constant 0 : i32
    %c0_i32_1 = arith.constant 0 : i32
    return %c0_i32, %c0_i32_0 : i32, i32
  }
  func.func @transform_14(%arg0: i32) -> (i32, i32) {
    %c0_i32 = arith.constant 0 : i32
    %c0_i32_0 = arith.constant 0 : i32
    %c0_i32_1 = arith.constant 0 : i32
    return %c0_i32, %c0_i32_0 : i32, i32
  }
  func.func @transform_15(%arg0: i32) -> (i32, i32) {
    %c0_i32 = arith.constant 0 : i32
    %c0_i32_0 = arith.constant 0 : i32
    %c0_i32_1 = arith.constant 0 : i32
    return %c0_i32, %c0_i32_0 : i32, i32
  }
  func.func @transform_16(%arg0: i32) -> (i32, i32) {
    %c0_i32 = arith.constant 0 : i32
    %c0_i32_0 = arith.constant 0 : i32
    %c0_i32_1 = arith.constant 0 : i32
    return %c0_i32, %c0_i32_0 : i32, i32
  }
  func.func @transform_17(%arg0: i32) -> (i32, i32, i32) {
    %c0_i32 = arith.constant 0 : i32
    %c0_i32_0 = arith.constant 0 : i32
    %c0_i32_1 = arith.constant 0 : i32
    return %arg0, %c0_i32, %c0_i32_0 : i32, i32, i32
  }
  func.func @transform_18(%arg0: i32) -> (i32, i32, i32) {
    %c0_i32 = arith.constant 0 : i32
    %c0_i32_0 = arith.constant 0 : i32
    %c0_i32_1 = arith.constant 0 : i32
    return %arg0, %c0_i32, %c0_i32_0 : i32, i32, i32
  }
  func.func @transform_19(%arg0: i32) -> (i32, i32, i32) {
    %c0_i32 = arith.constant 0 : i32
    %c0_i32_0 = arith.constant 0 : i32
    %c0_i32_1 = arith.constant 0 : i32
    return %arg0, %c0_i32, %c0_i32_0 : i32, i32, i32
  }
}

</mosaic_0001>

<bundles_post_ra>
// kernel: tdnn_lstm_forward.1
= control target key start
LH: loop header
LB: loop body
LE: loop exit
PB: predicated region body
PF: predicated region fallthrough
CT: control target
= control target key end

     0   :  { %s5497_s0 = inlined_call_operand.vmem [shape: bf16[2,32,20], index: 0, kind: input, shape index: {}]   ;;  %s5498_s1 = inlined_call_operand.vmem [shape: bf16[2,20,256], index: 1, kind: input, shape index: {}]   ;;  %s5499_s2 = inlined_call_operand.vmem [shape: f32[1,256], index: 2, kind: input, shape index: {}]   ;;  %s5500_s3 = inlined_call_operand.hbm [shape: bf16[256,1024], index: 3, kind: input, shape index: {}]   ;;  %s5501_s4 = inlined_call_operand.vmem [shape: f32[1,256], index: 4, kind: input, shape index: {}]   ;;  %s5502_s5 = inlined_call_operand.hbm [shape: bf16[256,256], index: 5, kind: input, shape index: {}]   ;;  %s5503_s6 = inlined_call_operand.vmem [shape: f32[1,256], index: 6, kind: input, shape index: {}]   ;;  %s5504_s7 = inlined_call_operand.hbm [shape: bf16[256,384], index: 7, kind: input, shape index: {}]   ;;  %s5505_s8 = inlined_call_operand.vmem [shape: f32[1,384], index: 8, kind: input, shape index: {}]   ;;  %s5506_s9 = inlined_call_operand.hbm [shape: bf16[128,384], index: 9, kind: input, shape index: {}]   ;;  %s5507_s10 = inlined_call_operand.vmem [shape: f32[1,384], index: 10, kind: input, shape index: {}]   ;;  %s5508_s11 = inlined_call_operand.vmem [shape: bf16[128,32], index: 11, kind: input, shape index: {}]   ;;  %s5509_s12 = inlined_call_operand.vmem [shape: f32[1,32], index: 12, kind: input, shape index: {}]   ;;  %s5510_s13 = inlined_call_operand.vmem [shape: bf16[32,32], index: 13, kind: input, shape index: {}]   ;;  %s5511_s14 = inlined_call_operand.vmem [shape: f32[1,32], index: 14, kind: input, shape index: {}]   ;;  %s5512_s15 = inlined_call_operand.vmem [shape: bf16[32,1], index: 15, kind: input, shape index: {}]   ;;  %s5513_s16 = inlined_call_operand.<no memory space> [shape: f32[1,1], index: 16, kind: input, shape index: {}]   ;;  %s5514_s17 = inlined_call_operand.vmem [shape: f32[2,1,1], index: 17, kind: output, shape index: {0}]   ;;  %s5515_s18 = inlined_call_operand.vmem [shape: f32[2,2,128], index: 18, kind: output, shape index: {1}]   ;;  %s5516_s19 = inlined_call_operand.vmem [shape: f32[2,2,128], index: 19, kind: output, shape index: {2}]  }
   0x1   :  { %5520 = sst [smem:[#allocation14_spill]] %s5497_s0  ;;  %v25_v0 = vstv %s5513_s16 }
   0x2   :  { %5521 = sst [smem:[#allocation15_spill]] %s5498_s1  ;;  %26 = vst [vmem:[#allocation2] sm:$0x1] %v25_v0 }
   0x3   :  { %5522 = sst [smem:[#allocation16_spill]] %s5499_s2 }
   0x4   :  { %5523 = sst [smem:[#allocation17_spill]] %s5500_s3 }
   0x5   :  { %5524 = sst [smem:[#allocation18_spill]] %s5502_s5 }
   0x6   :  { %5525 = sst [smem:[#allocation19_spill]] %s5511_s14 }
   0x7   :  { %5526 = sst [smem:[#allocation20_spill]] %s5512_s15 }
   0x8   :  { %5527 = sst [smem:[#allocation21_spill]] %s5514_s17 }
   0x9   :  { %27 = vsyncpa [#allocation4], 0 }
   0xa   :  { %28 = vsyncpa [#allocation6], 0 }
   0xb   :  { %29 = vsyncpa [#allocation9], 0  ;;  %s5084_s20 = smov 0  }
   0xc LB: > { %5528 = sst [smem:[#allocation13_spill]] %s4968_s20  ;;  %s5093_s16 = sadd.s32 4294967295, %s4968_s20   ;;  %s4968_s20 = sphi %s5084_s20, %s35_s20  }
   0xd   : > { %s5529_s5 = sld [smem:[#allocation18_spill]]  ;;  %p3453_p0 = scmp.ge.s32.totalorder %s4968_s20, 1 }
   0xe   : > { %p480_p1 = scmp.lt.s32.totalorder %s4968_s20, 3  ;;  %p4769_p2 = scmp.eq.s32.totalorder %s5093_s16, 0 }
   0xf   : > { %s4970_s23 = smov [#allocation5]   ;;  %s5531_s26 = sld [smem:[#allocation17_spill]] }
  0x10   : > { %p5098_p3 = pnand %p3453_p0, %p480_p1  ;;  %s516_s24 = sshll.u32 %s4970_s23, 4  ;;  %s517_s24 = int_to_ptr.vmem [resolvable:$true] %s516_s24 }
  0x11   : > { %s4971_s29 = smov [#allocation3]   ;;  %s4972_s30 = smov 128  }
  0x12   : > { %p4756_p4 = pneg %p5098_p3  ;;  %s499_s0 = sshll.u32 %s4971_s29, 4  ;;  %s500_s0 = int_to_ptr.vmem [resolvable:$true] %s499_s0 }
  0x13   : > { %s514_s22 = sshll.u32 %s5529_s5, 4  ;;  %s4973_s21 = smov 8   ;;  %s515_s22 = int_to_ptr.hbm [resolvable:$true] %s514_s22 }
  0x14   : > { %p5109_p5 = pnand %p4769_p2, %p4756_p4  ;;  %s531_s25 = sshll.u32 %s5504_s7, 4  ;;  %s532_s25 = int_to_ptr.hbm [resolvable:$true] %s531_s25 }
  0x15   : > { %s497_s27 = sshll.u32 %s5531_s26, 4  ;;  %s4974_s3 = smov 512   ;;  %s498_s27 = int_to_ptr.hbm [resolvable:$true] %s497_s27 }
  0x16   : > { %4762 = dma.hbm_to_vmem [thread:$0]  (!%p5109_p5), %s515_s22, 4096, %s517_s24, [#allocation6], %s4972_s30, %s4972_s30, %s4973_s21  }
  0x17   : > { %s4975_s26 = smov 32   ;;  %s4976_s5 = smov [#allocation7]  }
  0x18   : > { %4759 = dma.hbm_to_vmem [thread:$0]  (!%p5109_p5), %s498_s27, 16384, %s500_s0, [#allocation4], %s4974_s3, %s4974_s3, %s4975_s26  }
  0x19   : > { %s533_s20 = sshll.u32 %s4976_s5, 4  ;;  %s4977_s17 = smov 192   ;;  %s534_s20 = int_to_ptr.vmem [resolvable:$true] %s533_s20 }
  0x1a   : > { %s4978_s29 = smov 12   ;;  %s548_s22 = sshll.u32 %s5506_s9, 4  ;;  %s549_s22 = int_to_ptr.hbm [resolvable:$true] %s548_s22 }
  0x1b   : > { %4765 = dma.hbm_to_vmem [thread:$0]  (!%p5109_p5), %s532_s25, 6144, %s534_s20, [#allocation6], %s4977_s17, %s4977_s17, %s4978_s29  }
  0x1c   : > { %s4979_s24 = smov [#allocation8]   ;;  %595 = sbr.rel (%p5098_p3) target bundleno = 1456 (0x5b0), region = 88 }
  0x1d   : > { %s550_s30 = sshll.u32 %s4979_s24, 4  ;;  %s551_s30 = int_to_ptr.vmem [resolvable:$true] %s550_s30 }
  0x1e   : > { %4768 = dma.hbm_to_vmem [thread:$0]  (!%p5109_p5), %s549_s22, 3072, %s551_s30, [#allocation9], %s4977_s17, %s4977_s17, %s4978_s29  }
  0x21   : > { %4955 = dma.done.wait (%p4769_p2), [#allocation4], 16384  }
  0x22   : > { %4957 = vsyncadd (%p4769_p2), [#allocation4], 4294950912 }
  0x23   : > { %4959 = dma.done.wait (%p4769_p2), [#allocation6], 10240  }
  0x24   : > { %4961 = vsyncadd (%p4769_p2), [#allocation6], 4294957056 }
  0x25   : > { %4963 = dma.done.wait (%p4769_p2), [#allocation9], 3072  }
  0x26   : > { %4965 = vsyncadd (%p4769_p2), [#allocation9], 4294964224  ;;  %p673_p6 = scmp.lt.s32.totalorder %s5093_s16, 1  ;;  %vm749_vm0 = vcmask 1041408   ;;  %s5533_s17 = sld [smem:[#allocation15_spill]]  ;;  %vm742_vm2 = vcmask 162816  }
  0x27   : > { %s5534_s1 = sld [smem:[#allocation14_spill]]  ;;  %vm711_vm1 = vsmask.f32 7424  ;;  %v4552_v22 = vld [vmem:[#allocation3 + $0x1c4] sm:$0xf]  ;;  %vm1963_vm3 = vcmask 1045504  }
  0x28   : > { %s5541_s16 = smov (!%p673_p6, %s5093_s16), 1  ;;  %v3731_v23 = vld [vmem:[#allocation3 + $0x1e0] sm:$0xf0]  ;;  %v3729_v36 = vld [vmem:[#allocation3 + $0x1c0] sm:$0xf]  ;;  %vm2002_vm4 = vcmask 1043456  }
  0x29   : > { %s4489_s5 = sshll.u32 %s5541_s16, 4  ;;  %v4616_v24 = vld [vmem:[#allocation3 + $0x3c4] sm:$0xf]  ;;  %v4556_v37 = vld [vmem:[#allocation3 + $0x1dc] sm:$0xf0]  ;;  %v3734_v41 = vor.u32 %v4552_v22, %v3731_v23  ;;  %vm2381_vm5 = vcmask 1040384  }
  0x2a   : > { %v3987_v29 = vld [vmem:[#allocation3 + $0x3e0] sm:$0xf0]  ;;  %v3985_v38 = vld [vmem:[#allocation3 + $0x3c0] sm:$0xf]  ;;  %v3730_v49 = vor.u32 %v4556_v37, %v3729_v36  ;;  %s3466_s24 = sshll.u32 %s5541_s16, 1  ;;  %s5536_s26 = sld [smem:[#allocation20_spill]] }
  0x2b   : > { %v3990_v42 = vor.u32 %v4616_v24, %v3987_v29  ;;  %v4620_v43 = vld [vmem:[#allocation3 + $0x3dc] sm:$0xf0]  ;;  %v4544_v44 = vld [vmem:[#allocation3 + $0x184] sm:$0xf]  ;;  %s5438_s2 = scalar_lea.vmem %s5515_s18, %s3466_s24  ;;  %s5537_s14 = sld [smem:[#allocation19_spill]] }
  0x2c   : > { %v3470_v1 = vld [vmem:[%s5533_s17 + $0x28] sm:$0x33]  ;;  %v696_v2 = vld [vmem:[%s5533_s17 + $0x10] sm:$0x33]  ;;  %v3481_v3 = vld [vmem:[%s5533_s17 + $0x18] sm:$0xf]  ;;  %v3986_v50 = vor.u32 %v4620_v43, %v3985_v38 }
  0x2d   : > { %s677_s23 = scalar_lea.vmem %s5534_s1, %s4489_s5  ;;  %v734_v4 = vunpack.c.l.b16 %v3470_v1  ;;  %v735_v5 = vunpack.c.h.b16 %v3470_v1  ;;  %v801_v6 = vunpack.c.l.b16 %v696_v2  ;;  %v802_v7 = vunpack.c.h.b16 %v696_v2  ;;  %v4495_v8 = vld [vmem:[%s5533_s17 + $0x1c] sm:$0xf0]  ;;  %v4494_v9 = vld [vmem:[%s5533_s17 + $0x1c] sm:$0xf]  ;;  %v3483_v10 = vld [vmem:[%s5533_s17 + $0x20] sm:$0xf0]  ;;  %s5430_s5 = scalar_lea.vmem %s5516_s19, %s3466_s24 }
  0x2e   : > { %v3493_v11 = vld [vmem:[%s5533_s17] sm:$0xf]  ;;  %v4493_v12 = vld [vmem:[%s5533_s17 + $0x4] sm:$0xf0]  ;;  %v4492_v13 = vld [vmem:[%s5533_s17 + $0x4] sm:$0xf]  ;;  %v3482_v21 = vor.u32 %v4495_v8, %v3481_v3  ;;  %v3486_v30 = vor.u32 %v4494_v9, %v3483_v10 }
  0x2f   : > { %v738_v14 = vpack.c.b16 %v734_v4, %v734_v4  ;;  %v739_v15 = vpack.c.b16 %v735_v5, %v735_v5  ;;  %v805_v16 = vpack.c.b16 %v801_v6, %v801_v6  ;;  %v806_v17 = vpack.c.b16 %v802_v7, %v802_v7  ;;  %v3495_v18 = vld [vmem:[%s5533_s17 + $0x8] sm:$0xf0]  ;;  %v4490_v19 = vld [vmem:[%s677_s23] sm:$0xff]  ;;  %s5535_s1 = sld [smem:[#allocation16_spill]] }
  0x30   : > { %v5179_v20 = vld [vmem:[%s677_s23 + $0x8] sm:$0xff]  ;;  %v713_v31 = vshrl.u32 %v4490_v19, 16  ;;  %v715_v32 = vshll.u32 %v4490_v19, 16  ;;  %v3494_v34 = vor.u32 %v4493_v12, %v3493_v11  ;;  %v3498_v35 = vor.u32 %v4492_v13, %v3495_v18  ;;  %v3697_v51 = vld [vmem:[#allocation3 + $0x180] sm:$0xf]  ;;  %s5538_s27 = sld [smem:[#allocation21_spill]] }
  0x31   : > { %v751_v25 = vsel %vm749_vm0, %v738_v14, 0  ;;  %v754_v26 = vsel %vm749_vm0, %v739_v15, 0  ;;  %v814_v27 = vsel %vm749_vm0, %v805_v16, 0  ;;  %v817_v28 = vsel %vm749_vm0, %v806_v17, 0  ;;  %v3699_v45 = vld [vmem:[#allocation3 + $0x1a0] sm:$0xf0] }
  0x32   : > { %762 = vmatpush.bf16.msra.mxu0 %v751_v25  ;;  %781 = vmatpush.bf16.msra.mxu1 %v754_v26  ;;  %v720_v33 = vshll.u32 %v5179_v20, 16  ;;  %v717_v39 = vrot.slane %v715_v32, 1  ;;  %v4608_v46 = vld [vmem:[#allocation3 + $0x384] sm:$0xf]  ;;  %v4548_v52 = vld [vmem:[#allocation3 + $0x19c] sm:$0xf0]  ;;  %v3702_v54 = vor.u32 %v4544_v44, %v3699_v45 }
  0x33   : > { %825 = vmatpush.bf16.msra.mxu2 %v814_v27  ;;  %844 = vmatpush.bf16.msra.mxu3 %v817_v28  ;;  %v3955_v47 = vld [vmem:[#allocation3 + $0x3a0] sm:$0xf0]  ;;  %v3953_v56 = vld [vmem:[#allocation3 + $0x380] sm:$0xf]  ;;  %v3698_v62 = vor.u32 %v4548_v52, %v3697_v51  ;;  %v724_v2 = vshrl.u32 %v5179_v20, 16 }
  0x34   : > { %v722_v40 = vrot.slane %v720_v33, 1  ;;  %v718_v48 = vor.u32 %v717_v39, %v713_v31  ;;  %v3958_v55 = vor.u32 %v4608_v46, %v3955_v47  ;;  %v4612_v57 = vld [vmem:[#allocation3 + $0x39c] sm:$0xf0]  ;;  %v4536_v58 = vld [vmem:[#allocation3 + $0x144] sm:$0xf] }
  0x35   : > { %v3667_v59 = vld [vmem:[#allocation3 + $0x160] sm:$0xf0]  ;;  %v3954_v63 = vor.u32 %v4612_v57, %v3953_v56  ;;  %v3665_v4 = vld [vmem:[#allocation3 + $0x140] sm:$0xf] }
  0x36   : > { %763 = vmatpush.bf16.msra.mxu0 %v3482_v21  ;;  %782 = vmatpush.bf16.msra.mxu1 %v3486_v30  ;;  %v723_v53 = vsel %vm711_vm1, %v718_v48, %v722_v40  ;;  %v4600_v60 = vld [vmem:[#allocation3 + $0x344] sm:$0xf]  ;;  %v3670_v0 = vor.u32 %v4536_v58, %v3667_v59  ;;  %v726_v3 = vor.u32 %v724_v2, %v722_v40  ;;  %v4540_v5 = vld [vmem:[#allocation3 + $0x15c] sm:$0xf0]  ;;  %s680_s28 = scalar_lea.vmem %s5538_s27, %s5541_s16 }
  0x37   : > { %826 = vmatpush.bf16.msra.mxu2 %v3494_v34  ;;  %845 = vmatpush.bf16.msra.mxu3 %v3498_v35  ;;  %v3923_v61 = vld [vmem:[#allocation3 + $0x360] sm:$0xf0]  ;;  %v3921_v6 = vld [vmem:[#allocation3 + $0x340] sm:$0xf]  ;;  %v3666_v7 = vor.u32 %v4540_v5, %v3665_v4 }
  0x38   : > { %v3926_v1 = vor.u32 %v4600_v60, %v3923_v61  ;;  %v4604_v8 = vld [vmem:[#allocation3 + $0x35c] sm:$0xf0]  ;;  %v4528_v10 = vld [vmem:[#allocation3 + $0x104] sm:$0xf] }
  0x39   : > { %3487 = vmatmul.msk.bf16.vlgmr.msra.gmra.mxu0 %vm742_vm2, %v723_v53  ;;  %3489 = vmatmul.msk.bf16.vlgmr.msra.gmra.mxu1 %vm742_vm2, %v723_v53  ;;  %v3922_v9 = vor.u32 %v4604_v8, %v3921_v6  ;;  %v3635_v11 = vld [vmem:[#allocation3 + $0x120] sm:$0xf0]  ;;  %v3633_v15 = vld [vmem:[#allocation3 + $0x100] sm:$0xf]  ;;  %v4553_v6 = vld [vmem:[#allocation3 + $0x1cc] sm:$0xf] }
  0x3a   : > { %3499 = vmatmul.msk.bf16.vlgmr.msra.gmra.mxu2 %vm742_vm2, %v4490_v19  ;;  %3501 = vmatmul.msk.bf16.vlgmr.msra.gmra.mxu3 %vm742_vm2, %v4490_v19  ;;  %v4592_v12 = vld [vmem:[#allocation3 + $0x304] sm:$0xf]  ;;  %v3638_v13 = vor.u32 %v4528_v10, %v3635_v11  ;;  %v4532_v16 = vld [vmem:[#allocation3 + $0x11c] sm:$0xf0]  ;;  %v4617_v8 = vld [vmem:[#allocation3 + $0x3cc] sm:$0xf] }
  0x3b   : > { %1689 = vmatpush.bf16.msrb.mxu2 %v3734_v41  ;;  %1708 = vmatpush.bf16.msrb.mxu3 %v3990_v42  ;;  %v3891_v14 = vld [vmem:[#allocation3 + $0x320] sm:$0xf0]  ;;  %v3634_v18 = vor.u32 %v4532_v16, %v3633_v15  ;;  %v3889_v19 = vld [vmem:[#allocation3 + $0x300] sm:$0xf]  ;;  %v3995_v10 = vld [vmem:[#allocation3 + $0x3e8] sm:$0xf0] }
  0x3c   : > { %1651 = vmatpush.bf16.msrb.mxu0 %v3730_v49  ;;  %1670 = vmatpush.bf16.msrb.mxu1 %v3986_v50  ;;  %v3894_v17 = vor.u32 %v4592_v12, %v3891_v14  ;;  %v4596_v21 = vld [vmem:[#allocation3 + $0x31c] sm:$0xf0]  ;;  %v4520_v22 = vld [vmem:[#allocation3 + $0xc4] sm:$0xf]  ;;  %v3737_v11 = vld [vmem:[#allocation3 + $0x1c8] sm:$0xf] }
  0x3d   : > { %v3603_v23 = vld [vmem:[#allocation3 + $0xe0] sm:$0xf0]  ;;  %v3601_v27 = vld [vmem:[#allocation3 + $0xc0] sm:$0xf]  ;;  %v4557_v12 = vld [vmem:[#allocation3 + $0x1e4] sm:$0xf0] }
  0x3e   : > { %v4584_v24 = vld [vmem:[#allocation3 + $0x2c4] sm:$0xf]  ;;  %v3606_v25 = vor.u32 %v4520_v22, %v3603_v23  ;;  %v4524_v29 = vld [vmem:[#allocation3 + $0xdc] sm:$0xf0]  ;;  %v3738_v14 = vor.u32 %v4557_v12, %v3737_v11  ;;  %v3993_v15 = vld [vmem:[#allocation3 + $0x3c8] sm:$0xf] }
  0x3f   : > { %1690 = vmatpush.bf16.msrb.mxu2 %v3702_v54  ;;  %1709 = vmatpush.bf16.msrb.mxu3 %v3958_v55  ;;  %v3859_v26 = vld [vmem:[#allocation3 + $0x2e0] sm:$0xf0]  ;;  %v3857_v30 = vld [vmem:[#allocation3 + $0x2c0] sm:$0xf]  ;;  %v3602_v31 = vor.u32 %v4524_v29, %v3601_v27  ;;  %v4621_v16 = vld [vmem:[#allocation3 + $0x3e4] sm:$0xf0] }
  0x40   : > { %1652 = vmatpush.bf16.msrb.mxu0 %v3698_v62  ;;  %1671 = vmatpush.bf16.msrb.mxu1 %v3954_v63  ;;  %v3862_v28 = vor.u32 %v4584_v24, %v3859_v26  ;;  %v4588_v32 = vld [vmem:[#allocation3 + $0x2dc] sm:$0xf0]  ;;  %v4512_v34 = vld [vmem:[#allocation3 + $0x84] sm:$0xf]  ;;  %v3963_v22 = vld [vmem:[#allocation3 + $0x3a8] sm:$0xf0] }
  0x41   : > { %v3858_v33 = vor.u32 %v4588_v32, %v3857_v30  ;;  %v3571_v35 = vld [vmem:[#allocation3 + $0xa0] sm:$0xf0]  ;;  %v3569_v39 = vld [vmem:[#allocation3 + $0x80] sm:$0xf]  ;;  %v3705_v23 = vld [vmem:[#allocation3 + $0x188] sm:$0xf] }
  0x42   : > { %v4576_v36 = vld [vmem:[#allocation3 + $0x284] sm:$0xf]  ;;  %v3574_v37 = vor.u32 %v4512_v34, %v3571_v35  ;;  %v4516_v40 = vld [vmem:[#allocation3 + $0x9c] sm:$0xf0]  ;;  %v4549_v24 = vld [vmem:[#allocation3 + $0x1a4] sm:$0xf0] }
  0x43   : > { %1691 = vmatpush.bf16.msrb.mxu2 %v3670_v0  ;;  %1710 = vmatpush.bf16.msrb.mxu3 %v3926_v1  ;;  %v3827_v38 = vld [vmem:[#allocation3 + $0x2a0] sm:$0xf0]  ;;  %v3570_v42 = vor.u32 %v4516_v40, %v3569_v39  ;;  %v3825_v43 = vld [vmem:[#allocation3 + $0x280] sm:$0xf]  ;;  %v3706_v26 = vor.u32 %v4549_v24, %v3705_v23  ;;  %v3961_v27 = vld [vmem:[#allocation3 + $0x388] sm:$0xf] }
  0x44   : > { %1653 = vmatpush.bf16.msrb.mxu0 %v3666_v7  ;;  %1672 = vmatpush.bf16.msrb.mxu1 %v3922_v9  ;;  %v3830_v41 = vor.u32 %v4576_v36, %v3827_v38  ;;  %v4580_v44 = vld [vmem:[#allocation3 + $0x29c] sm:$0xf0]  ;;  %v4504_v46 = vld [vmem:[#allocation3 + $0x44] sm:$0xf]  ;;  %v3739_v7 = vld [vmem:[#allocation3 + $0x1e8] sm:$0xf0] }
  0x45   : > { %v3826_v45 = vor.u32 %v4580_v44, %v3825_v43  ;;  %v3539_v47 = vld [vmem:[#allocation3 + $0x60] sm:$0xf0]  ;;  %v3537_v51 = vld [vmem:[#allocation3 + $0x40] sm:$0xf]  ;;  %v3742_v9 = vor.u32 %v4553_v6, %v3739_v7  ;;  %v4537_v30 = vld [vmem:[#allocation3 + $0x14c] sm:$0xf] }
  0x46   : > { %v4568_v48 = vld [vmem:[#allocation3 + $0x244] sm:$0xf]  ;;  %v3542_v49 = vor.u32 %v4504_v46, %v3539_v47  ;;  %v4508_v52 = vld [vmem:[#allocation3 + $0x5c] sm:$0xf0]  ;;  %v4601_v32 = vld [vmem:[#allocation3 + $0x34c] sm:$0xf] }
  0x47   : > { %1692 = vmatpush.bf16.msrb.mxu2 %v3638_v13  ;;  %1711 = vmatpush.bf16.msrb.mxu3 %v3894_v17  ;;  %v3795_v50 = vld [vmem:[#allocation3 + $0x260] sm:$0xf0]  ;;  %v3538_v54 = vor.u32 %v4508_v52, %v3537_v51  ;;  %v3793_v55 = vld [vmem:[#allocation3 + $0x240] sm:$0xf]  ;;  %v3998_v13 = vor.u32 %v4617_v8, %v3995_v10  ;;  %v3994_v17 = vor.u32 %v4621_v16, %v3993_v15  ;;  %v3931_v36 = vld [vmem:[#allocation3 + $0x368] sm:$0xf0] }
  0x48   : > { %1654 = vmatpush.bf16.msrb.mxu0 %v3634_v18  ;;  %v3798_v53 = vor.u32 %v4568_v48, %v3795_v50  ;;  %v4572_v56 = vld [vmem:[#allocation3 + $0x25c] sm:$0xf0]  ;;  %v4496_v58 = vld [vmem:[#allocation3 + $0x4] sm:$0xf]  ;;  %v4545_v18 = vld [vmem:[#allocation3 + $0x18c] sm:$0xf]  ;;  %v3934_v39 = vor.u32 %v4601_v32, %v3931_v36 }
  0x49   : > { %3488 = vmatmul.msk.bf16.gmra.mxu0 %vm742_vm2, %v726_v3  ;;  %3490 = vmatmul.msk.bf16.gmra.mxu1 %vm742_vm2, %v726_v3  ;;  %v3794_v57 = vor.u32 %v4572_v56, %v3793_v55  ;;  %v3507_v59 = vld [vmem:[#allocation3 + $0x20] sm:$0xf0]  ;;  %v3505_v63 = vld [vmem:[#allocation3] sm:$0xf]  ;;  %v4541_v38 = vld [vmem:[#allocation3 + $0x164] sm:$0xf0] }
  0x4a   : > { %3500 = vmatmul.msk.bf16.gmra.mxu2 %vm742_vm2, %v5179_v20  ;;  %3502 = vmatmul.msk.bf16.gmra.mxu3 %vm742_vm2, %v5179_v20  ;;  %v3890_v20 = vor.u32 %v4596_v21, %v3889_v19  ;;  %v4560_v60 = vld [vmem:[#allocation3 + $0x204] sm:$0xf]  ;;  %v3510_v61 = vor.u32 %v4496_v58, %v3507_v59  ;;  %v4500_v0 = vld [vmem:[#allocation3 + $0x1c] sm:$0xf0]  ;;  %v3707_v19 = vld [vmem:[#allocation3 + $0x1a8] sm:$0xf0] }
  0x4b   : > { %1693 = vmatpush.bf16.msrb.mxu2 %v3606_v25  ;;  %1712 = vmatpush.bf16.msrb.mxu3 %v3862_v28  ;;  %v3763_v62 = vld [vmem:[#allocation3 + $0x220] sm:$0xf0]  ;;  %v3506_v2 = vor.u32 %v4500_v0, %v3505_v63  ;;  %v3761_v3 = vld [vmem:[#allocation3 + $0x200] sm:$0xf]  ;;  %v4609_v21 = vld [vmem:[#allocation3 + $0x38c] sm:$0xf] }
  0x4c   : > { %1673 = vmatpush.bf16.msrb.mxu1 %v3890_v20  ;;  %1655 = vmatpush.bf16.msrb.mxu0 %v3602_v31  ;;  %v3766_v1 = vor.u32 %v4560_v60, %v3763_v62  ;;  %v4564_v4 = vld [vmem:[#allocation3 + $0x21c] sm:$0xf0]  ;;  %v3710_v20 = vor.u32 %v4545_v18, %v3707_v19  ;;  %v3966_v25 = vor.u32 %v4609_v21, %v3963_v22  ;;  %v4613_v28 = vld [vmem:[#allocation3 + $0x3a4] sm:$0xf0]  ;;  %v3675_v31 = vld [vmem:[#allocation3 + $0x168] sm:$0xf0] }
  0x4d   : > { %v3762_v5 = vor.u32 %v4564_v4, %v3761_v3  ;;  %v3962_v29 = vor.u32 %v4613_v28, %v3961_v27  ;;  %v3678_v35 = vor.u32 %v4537_v30, %v3675_v31  ;;  %v857_v43 = vld [vmem:[%s5535_s1] sm:$0x3]  ;;  %v3643_v46 = vld [vmem:[#allocation3 + $0x128] sm:$0xf0]  ;;  %v3641_v50 = vld [vmem:[#allocation3 + $0x108] sm:$0xf] }
  0x4e   : > { %v4593_v47 = vld [vmem:[#allocation3 + $0x30c] sm:$0xf]  ;;  %v4533_v51 = vld [vmem:[#allocation3 + $0x124] sm:$0xf0]  ;;  %v5201_v56 = vperm.slane %v857_v43, 0 }
  0x4f   : > { %1694 = vmatpush.bf16.msrb.mxu2 %v3574_v37  ;;  %1713 = vmatpush.bf16.msrb.mxu3 %v3830_v41  ;;  %v3673_v37 = vld [vmem:[#allocation3 + $0x148] sm:$0xf]  ;;  %v4521_v60 = vld [vmem:[#allocation3 + $0xcc] sm:$0xf] }
  0x50   : > { %1674 = vmatpush.bf16.msrb.mxu1 %v3858_v33  ;;  %1656 = vmatpush.bf16.msrb.mxu0 %v3570_v42  ;;  %v3674_v40 = vor.u32 %v4541_v38, %v3673_v37  ;;  %v3929_v41 = vld [vmem:[#allocation3 + $0x348] sm:$0xf]  ;;  %v4585_v62 = vld [vmem:[#allocation3 + $0x2cc] sm:$0xf] }
  0x51   : > { %v4605_v42 = vld [vmem:[#allocation3 + $0x364] sm:$0xf0]  ;;  %v3867_v0 = vld [vmem:[#allocation3 + $0x2e8] sm:$0xf0] }
  0x52   : > { %v3930_v44 = vor.u32 %v4605_v42, %v3929_v41  ;;  %v4597_v55 = vld [vmem:[#allocation3 + $0x324] sm:$0xf0]  ;;  %v3870_v3 = vor.u32 %v4585_v62, %v3867_v0  ;;  %v4513_v7 = vld [vmem:[#allocation3 + $0x8c] sm:$0xf] }
  0x53   : > { %1695 = vmatpush.bf16.msrb.mxu2 %v3542_v49  ;;  %1714 = vmatpush.bf16.msrb.mxu3 %v3798_v53  ;;  %v3899_v49 = vld [vmem:[#allocation3 + $0x328] sm:$0xf0]  ;;  %v3642_v53 = vor.u32 %v4533_v51, %v3641_v50  ;;  %v4589_v6 = vld [vmem:[#allocation3 + $0x2e4] sm:$0xf0] }
  0x54   : > { %1675 = vmatpush.bf16.msrb.mxu1 %v3826_v45  ;;  %1657 = vmatpush.bf16.msrb.mxu0 %v3538_v54  ;;  %v4529_v45 = vld [vmem:[#allocation3 + $0x10c] sm:$0xf]  ;;  %v3902_v52 = vor.u32 %v4593_v47, %v3899_v49  ;;  %v3897_v54 = vld [vmem:[#allocation3 + $0x308] sm:$0xf] }
  0x55   : > { %v3646_v48 = vor.u32 %v4529_v45, %v3643_v46  ;;  %v3579_v11 = vld [vmem:[#allocation3 + $0xa8] sm:$0xf0]  ;;  %v4517_v18 = vld [vmem:[#allocation3 + $0xa4] sm:$0xf0] }
  0x56   : > { %v4577_v12 = vld [vmem:[#allocation3 + $0x28c] sm:$0xf]  ;;  %v3582_v15 = vor.u32 %v4513_v7, %v3579_v11  ;;  %v3833_v19 = vld [vmem:[#allocation3 + $0x288] sm:$0xf] }
  0x57   : > { %1696 = vmatpush.bf16.msrb.mxu2 %v3510_v61  ;;  %1715 = vmatpush.bf16.msrb.mxu3 %v3766_v1  ;;  %v3611_v61 = vld [vmem:[#allocation3 + $0xe8] sm:$0xf0]  ;;  %v3609_v1 = vld [vmem:[#allocation3 + $0xc8] sm:$0xf] }
  0x58   : > { %1676 = vmatpush.bf16.msrb.mxu1 %v3794_v57  ;;  %1658 = vmatpush.bf16.msrb.mxu0 %v3506_v2  ;;  %v3898_v57 = vor.u32 %v4597_v55, %v3897_v54  ;;  %v3614_v63 = vor.u32 %v4521_v60, %v3611_v61  ;;  %v4525_v2 = vld [vmem:[#allocation3 + $0xe4] sm:$0xf0]  ;;  %v4505_v24 = vld [vmem:[#allocation3 + $0x4c] sm:$0xf] }
  0x59   : > { %v3610_v4 = vor.u32 %v4525_v2, %v3609_v1  ;;  %v4581_v23 = vld [vmem:[#allocation3 + $0x2a4] sm:$0xf0]  ;;  %v4569_v27 = vld [vmem:[#allocation3 + $0x24c] sm:$0xf] }
  0x5a   : > { %v3803_v28 = vld [vmem:[#allocation3 + $0x268] sm:$0xf0]  ;;  %v3545_v30 = vld [vmem:[#allocation3 + $0x48] sm:$0xf] }
  0x5b   : > { %1765 = vmatpush.bf16.msra.mxu2 %v3742_v9  ;;  %1784 = vmatpush.bf16.msra.mxu3 %v3998_v13  ;;  %v3835_v13 = vld [vmem:[#allocation3 + $0x2a8] sm:$0xf0]  ;;  %v4509_v31 = vld [vmem:[#allocation3 + $0x64] sm:$0xf0] }
  0x5c   : > { %1677 = vmatpush.bf16.msrb.mxu1 %v3762_v5  ;;  %1727 = vmatpush.bf16.msra.mxu0 %v3738_v14  ;;  %v3865_v5 = vld [vmem:[#allocation3 + $0x2c8] sm:$0xf]  ;;  %v3838_v16 = vor.u32 %v4577_v12, %v3835_v13  ;;  %v3546_v37 = vor.u32 %v4509_v31, %v3545_v30  ;;  %v4561_v45 = vld [vmem:[#allocation3 + $0x20c] sm:$0xf]  ;;  %v4001_v13 = vld [vmem:[#allocation3 + $0x3d0] sm:$0xf] }
  0x5d   : > { %v3866_v10 = vor.u32 %v4589_v6, %v3865_v5  ;;  %v3801_v32 = vld [vmem:[#allocation3 + $0x248] sm:$0xf]  ;;  %v3771_v46 = vld [vmem:[#allocation3 + $0x228] sm:$0xf0]  ;;  %v3747_v5 = vld [vmem:[#allocation3 + $0x1f0] sm:$0xf0] }
  0x5e   : > { %v4573_v38 = vld [vmem:[#allocation3 + $0x264] sm:$0xf0]  ;;  %v4618_v6 = vld [vmem:[#allocation3 + $0x3d4] sm:$0xf] }
  0x5f   : > { %1766 = vmatpush.bf16.msra.mxu2 %v3710_v20  ;;  %1785 = vmatpush.bf16.msra.mxu3 %v3966_v25  ;;  %v5203_v20 = vperm.slane %v857_v43, 1  ;;  %v3834_v25 = vor.u32 %v4581_v23, %v3833_v19  ;;  %v3513_v47 = vld [vmem:[#allocation3 + $0x8] sm:$0xf]  ;;  %v3971_v19 = vld [vmem:[#allocation3 + $0x3b0] sm:$0xf0] }
  0x60   : > { %1746 = vmatpush.bf16.msra.mxu1 %v3994_v17  ;;  %1728 = vmatpush.bf16.msra.mxu0 %v3706_v26  ;;  %v3577_v17 = vld [vmem:[#allocation3 + $0x88] sm:$0xf]  ;;  %v3547_v26 = vld [vmem:[#allocation3 + $0x68] sm:$0xf0]  ;;  %v4538_v30 = vld [vmem:[#allocation3 + $0x154] sm:$0xf] }
  0x61   : > { %v3578_v22 = vor.u32 %v4517_v18, %v3577_v17  ;;  %v3769_v54 = vld [vmem:[#allocation3 + $0x208] sm:$0xf]  ;;  %v3715_v17 = vld [vmem:[#allocation3 + $0x1b0] sm:$0xf0] }
  0x62   : > { %v4565_v55 = vld [vmem:[#allocation3 + $0x224] sm:$0xf0]  ;;  %v4610_v18 = vld [vmem:[#allocation3 + $0x394] sm:$0xf] }
  0x63   : > { %1767 = vmatpush.bf16.msra.mxu2 %v3678_v35  ;;  %1786 = vmatpush.bf16.msra.mxu3 %v3934_v39  ;;  %v4497_v39 = vld [vmem:[#allocation3 + $0xc] sm:$0xf]  ;;  %v3770_v1 = vor.u32 %v4565_v55, %v3769_v54  ;;  %v3974_v23 = vor.u32 %v4610_v18, %v3971_v19  ;;  %v3907_v54 = vld [vmem:[#allocation3 + $0x330] sm:$0xf0]  ;;  %v3649_v55 = vld [vmem:[#allocation3 + $0x110] sm:$0xf] }
  0x64   : > { %1747 = vmatpush.bf16.msra.mxu1 %v3962_v29  ;;  %1729 = vmatpush.bf16.msra.mxu0 %v3674_v40  ;;  %v3550_v29 = vor.u32 %v4505_v24, %v3547_v26  ;;  %v3515_v40 = vld [vmem:[#allocation3 + $0x28] sm:$0xf0]  ;;  %v3713_v24 = vld [vmem:[#allocation3 + $0x190] sm:$0xf]  ;;  %v4514_v19 = vld [vmem:[#allocation3 + $0x94] sm:$0xf] }
  0x65   : > { %v3518_v51 = vor.u32 %v4497_v39, %v3515_v40  ;;  %v3969_v26 = vld [vmem:[#allocation3 + $0x390] sm:$0xf] }
  0x66   : > { %v4542_v39 = vld [vmem:[#allocation3 + $0x16c] sm:$0xf0] }
  0x67   : > { %1768 = vmatpush.bf16.msra.mxu2 %v3646_v48  ;;  %1787 = vmatpush.bf16.msra.mxu3 %v3902_v52  ;;  %v4501_v48 = vld [vmem:[#allocation3 + $0x24] sm:$0xf0]  ;;  %v3774_v52 = vor.u32 %v4561_v45, %v3771_v46  ;;  %v3937_v40 = vld [vmem:[#allocation3 + $0x350] sm:$0xf] }
  0x68   : > { %1748 = vmatpush.bf16.msra.mxu1 %v3930_v44  ;;  %1730 = vmatpush.bf16.msra.mxu0 %v3642_v53  ;;  %v3802_v44 = vor.u32 %v4573_v38, %v3801_v32  ;;  %v3514_v53 = vor.u32 %v4501_v48, %v3513_v47  ;;  %v3683_v32 = vld [vmem:[#allocation3 + $0x170] sm:$0xf0]  ;;  %v3681_v38 = vld [vmem:[#allocation3 + $0x150] sm:$0xf] }
  0x69   : > { %v3682_v45 = vor.u32 %v4542_v39, %v3681_v38  ;;  %v4606_v46 = vld [vmem:[#allocation3 + $0x36c] sm:$0xf0]  ;;  %v4530_v47 = vld [vmem:[#allocation3 + $0x114] sm:$0xf] }
  0x6a   : > { %v3651_v48 = vld [vmem:[#allocation3 + $0x130] sm:$0xf0]  ;;  %v4590_v18 = vld [vmem:[#allocation3 + $0x2ec] sm:$0xf0] }
  0x6b   : > { %1769 = vmatpush.bf16.msra.mxu2 %v3614_v63  ;;  %1788 = vmatpush.bf16.msra.mxu3 %v3870_v3  ;;  %v4510_v39 = vld [vmem:[#allocation3 + $0x6c] sm:$0xf0] }
  0x6c   : > { %1749 = vmatpush.bf16.msra.mxu1 %v3898_v57  ;;  %1731 = vmatpush.bf16.msra.mxu0 %v3610_v4  ;;  %v4554_v4 = vld [vmem:[#allocation3 + $0x1d4] sm:$0xf] }
  0x6d   : > { %v3750_v7 = vor.u32 %v4554_v4, %v3747_v5 }
  0x6f   : > { %1770 = vmatpush.bf16.msra.mxu2 %v3582_v15  ;;  %1789 = vmatpush.bf16.msra.mxu3 %v3838_v16  ;;  %v4546_v15 = vld [vmem:[#allocation3 + $0x194] sm:$0xf] }
  0x70   : > { %1750 = vmatpush.bf16.msra.mxu1 %v3866_v10  ;;  %1732 = vmatpush.bf16.msra.mxu0 %v3578_v22  ;;  %v4558_v10 = vld [vmem:[#allocation3 + $0x1ec] sm:$0xf0]  ;;  %v3718_v22 = vor.u32 %v4546_v15, %v3715_v17 }
  0x71   : > { %v3873_v17 = vld [vmem:[#allocation3 + $0x2d0] sm:$0xf] }
  0x73   : > { %1771 = vmatpush.bf16.msra.mxu2 %v3550_v29  ;;  %v4614_v29 = vld [vmem:[#allocation3 + $0x3ac] sm:$0xf0] }
  0x74   : > { %1751 = vmatpush.bf16.msra.mxu1 %v3834_v25  ;;  %1733 = vmatpush.bf16.msra.mxu0 %v3546_v37  ;;  %v4550_v25 = vld [vmem:[#allocation3 + $0x1ac] sm:$0xf0]  ;;  %v3970_v31 = vor.u32 %v4614_v29, %v3969_v26  ;;  %v3686_v37 = vor.u32 %v4538_v30, %v3683_v32  ;;  %v4506_v32 = vld [vmem:[#allocation3 + $0x54] sm:$0xf] }
  0x75   : > { %v3841_v29 = vld [vmem:[#allocation3 + $0x290] sm:$0xf] }
  0x77   : > { %1772 = vmatpush.bf16.msra.mxu2 %v3518_v51 }
  0x78   : > { %1752 = vmatpush.bf16.msra.mxu1 %v3802_v44  ;;  %1734 = vmatpush.bf16.msra.mxu0 %v3514_v53  ;;  %v4594_v53 = vld [vmem:[#allocation3 + $0x314] sm:$0xf] }
  0x7c   : > { %1753 = vmatpush.bf16.msra.mxu1 %v3770_v1  ;;  %v3905_v1 = vld [vmem:[#allocation3 + $0x310] sm:$0xf] }
  0xb6   : > { %v765_v33 = vpop.f32.mrf.mxu0  ;;  %v784_v34 = vpop.f32.mrf.mxu1 }
  0xbd   : > { %v828_v58 = vpop.f32.mrf.mxu2  ;;  %v847_v59 = vpop.f32.mrf.mxu3 }
  0xbe   : > { %v767_v8 = vpop.f32.mrf.mxu0  ;;  %v786_v9 = vpop.f32.mrf.mxu1  ;;  %v829_v14 = vadd.f32 %v828_v58, %v765_v33  ;;  %v848_v21 = vadd.f32 %v847_v59, %v784_v34  ;;  %v3806_v34 = vor.u32 %v4569_v27, %v3803_v28  ;;  %v3714_v28 = vor.u32 %v4550_v25, %v3713_v24  ;;  %v3843_v24 = vld [vmem:[#allocation3 + $0x2b0] sm:$0xf0] }
  0xc0   : > { %v863_v33 = vadd.f32 %v5201_v56, %v829_v14  ;;  %v864_v41 = vadd.f32 %v5203_v20, %v848_v21  ;;  %1790 = vmatpush.bf16.msra.mxu3 %v3806_v34  ;;  %v4622_v14 = vld [vmem:[#allocation3 + $0x3ec] sm:$0xf0] }
  0xc1   : > { %v4002_v16 = vor.u32 %v4622_v14, %v4001_v13  ;;  %v3617_v13 = vld [vmem:[#allocation3 + $0xd0] sm:$0xf] }
  0xc2   : > { %v871_v57 = vmax.f32 %v863_v33, 0.0  ;;  %v872_v58 = vmax.f32 %v864_v41, 0.0  ;;  %v4602_v33 = vld [vmem:[#allocation3 + $0x354] sm:$0xf]  ;;  %v4526_v14 = vld [vmem:[#allocation3 + $0xec] sm:$0xf0] }
  0xc4   : > { %1791 = vmatpush.bf16.msra.mxu3 %v3774_v52  ;;  %v3938_v52 = vor.u32 %v4606_v46, %v3937_v40  ;;  %v3809_v40 = vld [vmem:[#allocation3 + $0x250] sm:$0xf]  ;;  %v4562_v46 = vld [vmem:[#allocation3 + $0x214] sm:$0xf] }
  0xc5   : > { %v830_v35 = vpop.f32.mrf.mxu2  ;;  %v849_v36 = vpop.f32.mrf.mxu3 }
  0xc6   : > { %v831_v42 = vadd.f32 %v830_v35, %v767_v8  ;;  %v850_v43 = vadd.f32 %v849_v36, %v786_v9  ;;  %v770_v61 = vpop.f32.mrf.mxu0  ;;  %v789_v62 = vpop.f32.mrf.mxu1  ;;  %v4003_v8 = vld [vmem:[#allocation3 + $0x3f0] sm:$0xf0]  ;;  %v3745_v9 = vld [vmem:[#allocation3 + $0x1d0] sm:$0xf] }
  0xc7   : > { %v4006_v11 = vor.u32 %v4618_v6, %v4003_v8  ;;  %v3746_v12 = vor.u32 %v4558_v10, %v3745_v9  ;;  %v3939_v35 = vld [vmem:[#allocation3 + $0x370] sm:$0xf0] }
  0xc8   : > { %v865_v49 = vadd.f32 %v5201_v56, %v831_v42  ;;  %v866_v50 = vadd.f32 %v5203_v20, %v850_v43  ;;  %v3942_v44 = vor.u32 %v4602_v33, %v3939_v35  ;;  %v3619_v9 = vld [vmem:[#allocation3 + $0xf0] sm:$0xf0] }
  0xc9   : > { %v4586_v10 = vld [vmem:[#allocation3 + $0x2d4] sm:$0xf] }
  0xca   : > { %v873_v59 = vmax.f32 %v865_v49, 0.0  ;;  %v874_v60 = vmax.f32 %v866_v50, 0.0  ;;  %v3555_v33 = vld [vmem:[#allocation3 + $0x70] sm:$0xf0] }
  0xcb   : > { %v4570_v35 = vld [vmem:[#allocation3 + $0x254] sm:$0xf]  ;;  %v3558_v38 = vor.u32 %v4506_v32, %v3555_v33  ;;  %v4531_v32 = vld [vmem:[#allocation3 + $0x11c] sm:$0xf] }
  0xcc   : > { %v5209_v63 = vpack.c.bf16 %v873_v59, %v871_v57  ;;  %v5211_v0 = vpack.c.bf16 %v874_v60, %v872_v58  ;;  %v4534_v57 = vld [vmem:[#allocation3 + $0x12c] sm:$0xf0]  ;;  %v3654_v60 = vor.u32 %v4530_v47, %v3651_v48  ;;  %v3779_v47 = vld [vmem:[#allocation3 + $0x230] sm:$0xf0]  ;;  %v3659_v33 = vld [vmem:[#allocation3 + $0x138] sm:$0xf0] }
  0xcd   : > { %v833_v2 = vpop.f32.mrf.mxu2  ;;  %v852_v3 = vpop.f32.mrf.mxu3  ;;  %v3521_v48 = vld [vmem:[#allocation3 + $0x10] sm:$0xf] }
  0xce   : > { %1659 = vmatmul.bf16.vlgmr.msrb.gmra.mxu0 %v5209_v63  ;;  %1678 = vmatmul.bf16.vlgmr.msrb.gmra.mxu1 %v5211_v0  ;;  %v834_v21 = vadd.f32 %v833_v2, %v770_v61  ;;  %v853_v27 = vadd.f32 %v852_v3, %v789_v62  ;;  %v772_v36 = vpop.f32.mrf.mxu0  ;;  %v791_v34 = vpop.f32.mrf.mxu1  ;;  %v3910_v61 = vor.u32 %v4594_v53, %v3907_v54  ;;  %v4598_v2 = vld [vmem:[#allocation3 + $0x32c] sm:$0xf0] }
  0xcf   : > { %1697 = vmatmul.bf16.vlgmr.msrb.gmra.mxu2 %v5209_v63  ;;  %1716 = vmatmul.bf16.vlgmr.msrb.gmra.mxu3 %v5211_v0  ;;  %v3650_v62 = vor.u32 %v4534_v57, %v3649_v55  ;;  %v3777_v54 = vld [vmem:[#allocation3 + $0x210] sm:$0xf] }
  0xd0   : > { %1841 = vmatpush.bf16.msrb.mxu2 %v3750_v7  ;;  %1860 = vmatpush.bf16.msrb.mxu3 %v4006_v11  ;;  %v867_v41 = vadd.f32 %v5201_v56, %v834_v21  ;;  %v868_v49 = vadd.f32 %v5203_v20, %v853_v27  ;;  %v3874_v21 = vor.u32 %v4590_v18, %v3873_v17  ;;  %v3585_v27 = vld [vmem:[#allocation3 + $0x90] sm:$0xf]  ;;  %v4615_v18 = vld [vmem:[#allocation3 + $0x3b4] sm:$0xf0] }
  0xd1   : > { %1803 = vmatpush.bf16.msrb.mxu0 %v3746_v12  ;;  %1822 = vmatpush.bf16.msrb.mxu1 %v4002_v16  ;;  %v3875_v12 = vld [vmem:[#allocation3 + $0x2f0] sm:$0xf0]  ;;  %v3618_v16 = vor.u32 %v4526_v14, %v3617_v13  ;;  %v4566_v55 = vld [vmem:[#allocation3 + $0x22c] sm:$0xf0]  ;;  %v3721_v14 = vld [vmem:[#allocation3 + $0x198] sm:$0xf] }
  0xd2   : > { %v875_v3 = vmax.f32 %v867_v41, 0.0  ;;  %v876_v4 = vmax.f32 %v868_v49, 0.0  ;;  %v3878_v15 = vor.u32 %v4586_v10, %v3875_v12  ;;  %v4574_v41 = vld [vmem:[#allocation3 + $0x26c] sm:$0xf0]  ;;  %v3778_v57 = vor.u32 %v4566_v55, %v3777_v54  ;;  %v4611_v10 = vld [vmem:[#allocation3 + $0x39c] sm:$0xf] }
  0xd3   : > { %v4502_v49 = vld [vmem:[#allocation3 + $0x2c] sm:$0xf0]  ;;  %v3881_v54 = vld [vmem:[#allocation3 + $0x2d8] sm:$0xf] }
  0xd4   : > { %1842 = vmatpush.bf16.msrb.mxu2 %v3718_v22  ;;  %1861 = vmatpush.bf16.msrb.mxu3 %v3974_v23  ;;  %v3587_v22 = vld [vmem:[#allocation3 + $0xb0] sm:$0xf0]  ;;  %v3522_v53 = vor.u32 %v4502_v49, %v3521_v48  ;;  %v3883_v49 = vld [vmem:[#allocation3 + $0x2f8] sm:$0xf0]  ;;  %v4591_v55 = vld [vmem:[#allocation3 + $0x2f4] sm:$0xf0] }
  0xd5   : > { %v835_v42 = vpop.f32.mrf.mxu2  ;;  %v854_v43 = vpop.f32.mrf.mxu3  ;;  %1804 = vmatpush.bf16.msrb.mxu0 %v3714_v28  ;;  %1823 = vmatpush.bf16.msrb.mxu1 %v3970_v31  ;;  %v4578_v23 = vld [vmem:[#allocation3 + $0x294] sm:$0xf]  ;;  %v3590_v25 = vor.u32 %v4514_v19, %v3587_v22  ;;  %v4518_v28 = vld [vmem:[#allocation3 + $0xac] sm:$0xf0]  ;;  %v4539_v19 = vld [vmem:[#allocation3 + $0x15c] sm:$0xf] }
  0xd6   : > { %v836_v50 = vadd.f32 %v835_v42, %v772_v36  ;;  %v855_v51 = vadd.f32 %v854_v43, %v791_v34  ;;  %v3846_v26 = vor.u32 %v4578_v23, %v3843_v24  ;;  %v3586_v30 = vor.u32 %v4518_v28, %v3585_v27  ;;  %v4582_v31 = vld [vmem:[#allocation3 + $0x2ac] sm:$0xf0]  ;;  %v3811_v36 = vld [vmem:[#allocation3 + $0x270] sm:$0xf0]  ;;  %v4603_v23 = vld [vmem:[#allocation3 + $0x35c] sm:$0xf] }
  0xd7   : > { %v3553_v34 = vld [vmem:[#allocation3 + $0x50] sm:$0xf]  ;;  %v3814_v42 = vor.u32 %v4570_v35, %v3811_v36  ;;  %v3947_v24 = vld [vmem:[#allocation3 + $0x378] sm:$0xf0]  ;;  %v4543_v27 = vld [vmem:[#allocation3 + $0x174] sm:$0xf0] }
  0xd8   : > { %v869_v58 = vadd.f32 %v5201_v56, %v836_v50  ;;  %v870_v59 = vadd.f32 %v5203_v20, %v855_v51  ;;  %1843 = vmatpush.bf16.msrb.mxu2 %v3686_v37  ;;  %1862 = vmatpush.bf16.msrb.mxu3 %v3942_v44  ;;  %v3906_v56 = vor.u32 %v4598_v2, %v3905_v1  ;;  %v4522_v20 = vld [vmem:[#allocation3 + $0xd4] sm:$0xf]  ;;  %v3753_v1 = vld [vmem:[#allocation3 + $0x1d8] sm:$0xf]  ;;  %v4595_v35 = vld [vmem:[#allocation3 + $0x31c] sm:$0xf] }
  0xd9   : > { %1805 = vmatpush.bf16.msrb.mxu0 %v3682_v45  ;;  %1824 = vmatpush.bf16.msrb.mxu1 %v3938_v52  ;;  %v3622_v11 = vor.u32 %v4522_v20, %v3619_v9  ;;  %v3842_v37 = vor.u32 %v4582_v31, %v3841_v29  ;;  %v3554_v43 = vor.u32 %v4510_v39, %v3553_v34  ;;  %v4498_v44 = vld [vmem:[#allocation3 + $0x14] sm:$0xf]  ;;  %v4559_v2 = vld [vmem:[#allocation3 + $0x1f4] sm:$0xf0]  ;;  %v3723_v9 = vld [vmem:[#allocation3 + $0x1b8] sm:$0xf0] }
  0xda   : > { %v877_v5 = vmax.f32 %v869_v58, 0.0  ;;  %v878_v6 = vmax.f32 %v870_v59, 0.0  ;;  %v3523_v45 = vld [vmem:[#allocation3 + $0x30] sm:$0xf0]  ;;  %v3810_v50 = vor.u32 %v4574_v41, %v3809_v40  ;;  %v3782_v52 = vor.u32 %v4562_v46, %v3779_v47  ;;  %v4555_v58 = vld [vmem:[#allocation3 + $0x1dc] sm:$0xf] }
  0xdb   : > { %v3526_v51 = vor.u32 %v4498_v44, %v3523_v45  ;;  %v3755_v59 = vld [vmem:[#allocation3 + $0x1f8] sm:$0xf0]  ;;  %v3945_v28 = vld [vmem:[#allocation3 + $0x358] sm:$0xf]  ;;  %v3662_v39 = vor.u32 %v4531_v32, %v3659_v33 }
  0xdc   : > { %v5221_v7 = vpack.c.bf16 %v877_v5, %v875_v3  ;;  %v5223_v8 = vpack.c.bf16 %v878_v6, %v876_v4  ;;  %1844 = vmatpush.bf16.msrb.mxu2 %v3654_v60  ;;  %1863 = vmatpush.bf16.msrb.mxu3 %v3910_v61  ;;  %v4619_v60 = vld [vmem:[#allocation3 + $0x3dc] sm:$0xf]  ;;  %v3758_v61 = vor.u32 %v4555_v58, %v3755_v59  ;;  %v4009_v5 = vld [vmem:[#allocation3 + $0x3d8] sm:$0xf] }
  0xdd   : > { %1806 = vmatpush.bf16.msrb.mxu0 %v3650_v62  ;;  %1825 = vmatpush.bf16.msrb.mxu1 %v3906_v56  ;;  %v4011_v62 = vld [vmem:[#allocation3 + $0x3f8] sm:$0xf0]  ;;  %v3754_v4 = vor.u32 %v4559_v2, %v3753_v1  ;;  %v4623_v6 = vld [vmem:[#allocation3 + $0x3f4] sm:$0xf0]  ;;  %v3882_v58 = vor.u32 %v4591_v55, %v3881_v54 }
  0xde   : > { %1664 = vmatmul.bf16.gmra.mxu0 %v5221_v7  ;;  %1683 = vmatmul.bf16.gmra.mxu1 %v5223_v8  ;;  %v4014_v3 = vor.u32 %v4619_v60, %v4011_v62  ;;  %v4547_v56 = vld [vmem:[#allocation3 + $0x19c] sm:$0xf]  ;;  %v4010_v20 = vor.u32 %v4623_v6, %v4009_v5  ;;  %v4607_v29 = vld [vmem:[#allocation3 + $0x374] sm:$0xf0] }
  0xdf   : > { %1702 = vmatmul.bf16.gmra.mxu2 %v5221_v7  ;;  %1721 = vmatmul.bf16.gmra.mxu3 %v5223_v8  ;;  %v3726_v12 = vor.u32 %v4547_v56, %v3723_v9  ;;  %v3946_v36 = vor.u32 %v4607_v29, %v3945_v28  ;;  %v3915_v34 = vld [vmem:[#allocation3 + $0x338] sm:$0xf0]  ;;  %v3593_v2 = vld [vmem:[#allocation3 + $0x98] sm:$0xf] }
  0xe0   : > { %1845 = vmatpush.bf16.msrb.mxu2 %v3622_v11  ;;  %1864 = vmatpush.bf16.msrb.mxu3 %v3878_v15  ;;  %v3979_v11 = vld [vmem:[#allocation3 + $0x3b8] sm:$0xf0]  ;;  %v4551_v15 = vld [vmem:[#allocation3 + $0x1b4] sm:$0xf0]  ;;  %v3918_v40 = vor.u32 %v4595_v35, %v3915_v34 }
  0xe1   : > { %1807 = vmatpush.bf16.msrb.mxu0 %v3618_v16  ;;  %1826 = vmatpush.bf16.msrb.mxu1 %v3874_v21  ;;  %v3982_v13 = vor.u32 %v4611_v10, %v3979_v11  ;;  %v3977_v16 = vld [vmem:[#allocation3 + $0x398] sm:$0xf]  ;;  %v3722_v17 = vor.u32 %v4551_v15, %v3721_v14  ;;  %v3691_v21 = vld [vmem:[#allocation3 + $0x178] sm:$0xf0] }
  0xe2   : > { %v3978_v22 = vor.u32 %v4615_v18, %v3977_v16  ;;  %v4523_v45 = vld [vmem:[#allocation3 + $0xdc] sm:$0xf]  ;;  %v4583_v6 = vld [vmem:[#allocation3 + $0x2b4] sm:$0xf0] }
  0xe3   : > { %v3627_v46 = vld [vmem:[#allocation3 + $0xf8] sm:$0xf0]  ;;  %v3561_v11 = vld [vmem:[#allocation3 + $0x58] sm:$0xf] }
  0xe4   : > { %1846 = vmatpush.bf16.msrb.mxu2 %v3590_v25  ;;  %1865 = vmatpush.bf16.msrb.mxu3 %v3846_v26  ;;  %v3689_v25 = vld [vmem:[#allocation3 + $0x158] sm:$0xf]  ;;  %v3694_v26 = vor.u32 %v4539_v19, %v3691_v21  ;;  %v4587_v47 = vld [vmem:[#allocation3 + $0x2dc] sm:$0xf]  ;;  %v3630_v48 = vor.u32 %v4523_v45, %v3627_v46 }
  0xe5   : > { %1808 = vmatpush.bf16.msrb.mxu0 %v3586_v30  ;;  %1827 = vmatpush.bf16.msrb.mxu1 %v3842_v37  ;;  %v3950_v30 = vor.u32 %v4603_v23, %v3947_v24  ;;  %v3690_v31 = vor.u32 %v4543_v27, %v3689_v25  ;;  %v3657_v37 = vld [vmem:[#allocation3 + $0x118] sm:$0xf]  ;;  %v3595_v59 = vld [vmem:[#allocation3 + $0xb8] sm:$0xf0] }
  0xe6   : > { %v4579_v60 = vld [vmem:[#allocation3 + $0x29c] sm:$0xf]  ;;  %v4511_v14 = vld [vmem:[#allocation3 + $0x74] sm:$0xf0] }
  0xe7   : > { %v4507_v56 = vld [vmem:[#allocation3 + $0x5c] sm:$0xf]  ;;  %v3817_v15 = vld [vmem:[#allocation3 + $0x258] sm:$0xf]  ;;  %v3562_v18 = vor.u32 %v4511_v14, %v3561_v11 }
  0xe8   : > { %1847 = vmatpush.bf16.msrb.mxu2 %v3558_v38  ;;  %1866 = vmatpush.bf16.msrb.mxu3 %v3814_v42  ;;  %v4535_v38 = vld [vmem:[#allocation3 + $0x134] sm:$0xf0]  ;;  %v4571_v9 = vld [vmem:[#allocation3 + $0x25c] sm:$0xf] }
  0xe9   : > { %1809 = vmatpush.bf16.msrb.mxu0 %v3554_v43  ;;  %1828 = vmatpush.bf16.msrb.mxu1 %v3810_v50  ;;  %v3658_v41 = vor.u32 %v4535_v38, %v3657_v37  ;;  %v3913_v42 = vld [vmem:[#allocation3 + $0x318] sm:$0xf]  ;;  %v3819_v10 = vld [vmem:[#allocation3 + $0x278] sm:$0xf0] }
  0xea   : > { %v4599_v43 = vld [vmem:[#allocation3 + $0x334] sm:$0xf0]  ;;  %v4499_v19 = vld [vmem:[#allocation3 + $0x1c] sm:$0xf] }
  0xeb   : > { %v3914_v44 = vor.u32 %v4599_v43, %v3913_v42  ;;  %v3625_v50 = vld [vmem:[#allocation3 + $0xd8] sm:$0xf]  ;;  %v3531_v21 = vld [vmem:[#allocation3 + $0x38] sm:$0xf0] }
  0xec   : > { %1848 = vmatpush.bf16.msrb.mxu2 %v3526_v51  ;;  %1867 = vmatpush.bf16.msrb.mxu3 %v3782_v52  ;;  %v4527_v51 = vld [vmem:[#allocation3 + $0xf4] sm:$0xf0]  ;;  %v3886_v52 = vor.u32 %v4587_v47, %v3883_v49  ;;  %v3787_v23 = vld [vmem:[#allocation3 + $0x238] sm:$0xf0]  ;;  %v3534_v27 = vor.u32 %v4499_v19, %v3531_v21 }
  0xed   : > { %1810 = vmatpush.bf16.msrb.mxu0 %v3522_v53  ;;  %1829 = vmatpush.bf16.msrb.mxu1 %v3778_v57  ;;  %v3626_v53 = vor.u32 %v4527_v51, %v3625_v50  ;;  %v4515_v57 = vld [vmem:[#allocation3 + $0x9c] sm:$0xf]  ;;  %v4575_v16 = vld [vmem:[#allocation3 + $0x274] sm:$0xf0] }
  0xee   : > { %1735 = vmatmul.bf16.vlgmr.msra.gmra.mxu0 %v5209_v63  ;;  %1754 = vmatmul.bf16.vlgmr.msra.gmra.mxu1 %v5211_v0  ;;  %v3598_v62 = vor.u32 %v4515_v57, %v3595_v59  ;;  %v3529_v24 = vld [vmem:[#allocation3 + $0x18] sm:$0xf] }
  0xef   : > { %1773 = vmatmul.bf16.vlgmr.msra.gmra.mxu2 %v5209_v63  ;;  %1792 = vmatmul.bf16.vlgmr.msra.gmra.mxu3 %v5211_v0  ;;  %v4503_v25 = vld [vmem:[#allocation3 + $0x34] sm:$0xf0] }
  0xf0   : > { %1917 = vmatpush.bf16.msra.mxu2 %v3758_v61  ;;  %1936 = vmatpush.bf16.msra.mxu3 %v4014_v3  ;;  %v3851_v61 = vld [vmem:[#allocation3 + $0x2b8] sm:$0xf0]  ;;  %v4519_v3 = vld [vmem:[#allocation3 + $0xb4] sm:$0xf0]  ;;  %v3530_v29 = vor.u32 %v4503_v25, %v3529_v24  ;;  %v4638_v25 = vld [vmem:[#allocation5 + $0x74] sm:$0xf] }
  0xf1   : > { %1879 = vmatpush.bf16.msra.mxu0 %v3754_v4  ;;  %1898 = vmatpush.bf16.msra.mxu1 %v4010_v20  ;;  %v3854_v1 = vor.u32 %v4579_v60, %v3851_v61  ;;  %v3849_v4 = vld [vmem:[#allocation3 + $0x298] sm:$0xf]  ;;  %v3594_v5 = vor.u32 %v4519_v3, %v3593_v2  ;;  %v3563_v20 = vld [vmem:[#allocation3 + $0x78] sm:$0xf0] }
  0xf2   : > { %v4639_v24 = vld [vmem:[#allocation5 + $0x74] sm:$0xf0] }
  0xf4   : > { %1918 = vmatpush.bf16.msra.mxu2 %v3726_v12  ;;  %1937 = vmatpush.bf16.msra.mxu3 %v3982_v13  ;;  %v3850_v12 = vor.u32 %v4583_v6, %v3849_v4  ;;  %v3566_v13 = vor.u32 %v4507_v56, %v3563_v20 }
  0xf5   : > { %1880 = vmatpush.bf16.msra.mxu0 %v3722_v17  ;;  %1899 = vmatpush.bf16.msra.mxu1 %v3978_v22  ;;  %v3822_v17 = vor.u32 %v4571_v9, %v3819_v10  ;;  %v4563_v22 = vld [vmem:[#allocation3 + $0x21c] sm:$0xf] }
  0xf6   : > { %v3790_v28 = vor.u32 %v4563_v22, %v3787_v23  ;;  %v4073_v23 = vld [vmem:[#allocation5 + $0x70] sm:$0xf] }
  0xf8   : > { %1919 = vmatpush.bf16.msra.mxu2 %v3694_v26  ;;  %1938 = vmatpush.bf16.msra.mxu3 %v3950_v30  ;;  %v3818_v26 = vor.u32 %v4575_v16, %v3817_v15  ;;  %v3785_v30 = vld [vmem:[#allocation3 + $0x218] sm:$0xf] }
  0xf9   : > { %1881 = vmatpush.bf16.msra.mxu0 %v3690_v31  ;;  %1900 = vmatpush.bf16.msra.mxu1 %v3946_v36  ;;  %v4567_v31 = vld [vmem:[#allocation3 + $0x234] sm:$0xf0] }
  0xfa   : > { %v3786_v32 = vor.u32 %v4567_v31, %v3785_v30 }
  0xfc   : > { %1920 = vmatpush.bf16.msra.mxu2 %v3662_v39  ;;  %1939 = vmatpush.bf16.msra.mxu3 %v3918_v40 }
  0xfd   : > { %1882 = vmatpush.bf16.msra.mxu0 %v3658_v41  ;;  %1901 = vmatpush.bf16.msra.mxu1 %v3914_v44 }
  0xfe   : > { %1740 = vmatmul.bf16.gmra.mxu0 %v5221_v7  ;;  %1759 = vmatmul.bf16.gmra.mxu1 %v5223_v8 }
  0xff   : > { %1778 = vmatmul.bf16.gmra.mxu2 %v5221_v7  ;;  %1797 = vmatmul.bf16.gmra.mxu3 %v5223_v8 }
 0x100   : > { %1921 = vmatpush.bf16.msra.mxu2 %v3630_v48  ;;  %1940 = vmatpush.bf16.msra.mxu3 %v3886_v52 }
 0x101   : > { %1883 = vmatpush.bf16.msra.mxu0 %v3626_v53  ;;  %1902 = vmatpush.bf16.msra.mxu1 %v3882_v58 }
 0x104   : > { %1922 = vmatpush.bf16.msra.mxu2 %v3598_v62  ;;  %1941 = vmatpush.bf16.msra.mxu3 %v3854_v1 }
 0x105   : > { %1884 = vmatpush.bf16.msra.mxu0 %v3594_v5  ;;  %1903 = vmatpush.bf16.msra.mxu1 %v3850_v12 }
 0x108   : > { %1923 = vmatpush.bf16.msra.mxu2 %v3566_v13  ;;  %1942 = vmatpush.bf16.msra.mxu3 %v3822_v17 }
 0x109   : > { %1885 = vmatpush.bf16.msra.mxu0 %v3562_v18  ;;  %1904 = vmatpush.bf16.msra.mxu1 %v3818_v26 }
 0x10c   : > { %1924 = vmatpush.bf16.msra.mxu2 %v3534_v27  ;;  %1943 = vmatpush.bf16.msra.mxu3 %v3790_v28  ;;  %v4074_v28 = vor.u32 %v4639_v24, %v4073_v23  ;;  %v4650_v24 = vld [vmem:[#allocation5 + $0xd4] sm:$0xf] }
 0x10d   : > { %1886 = vmatpush.bf16.msra.mxu0 %v3530_v29  ;;  %1905 = vmatpush.bf16.msra.mxu1 %v3786_v32  ;;  %v4075_v29 = vld [vmem:[#allocation5 + $0x78] sm:$0xf0] }
 0x10e   : > { %1811 = vmatmul.bf16.vlgmr.msrb.gmra.mxu0 %v5209_v63  ;;  %1830 = vmatmul.bf16.vlgmr.msrb.gmra.mxu1 %v5211_v0  ;;  %v4078_v32 = vor.u32 %v4638_v25, %v4075_v29  ;;  %v4123_v25 = vld [vmem:[#allocation5 + $0xd8] sm:$0xf0]  ;;  %v4121_v29 = vld [vmem:[#allocation5 + $0xd0] sm:$0xf] }
 0x10f   : > { %1849 = vmatmul.bf16.vlgmr.msrb.gmra.mxu2 %v5209_v63  ;;  %1868 = vmatmul.bf16.vlgmr.msrb.gmra.mxu3 %v5211_v0 }
 0x110   : > { %2333 = vmatpush.bf16.msrb.mxu2 %v4078_v32  ;;  %v4041_v32 = vld [vmem:[#allocation5 + $0x30] sm:$0xf] }
 0x111   : > { %2295 = vmatpush.bf16.msrb.mxu0 %v4074_v28  ;;  %v4126_v28 = vor.u32 %v4650_v24, %v4123_v25 }
 0x11e   : > { %1816 = vmatmul.bf16.gmra.mxu0 %v5221_v7  ;;  %1835 = vmatmul.bf16.gmra.mxu1 %v5223_v8 }
 0x11f   : > { %1854 = vmatmul.bf16.gmra.mxu2 %v5221_v7  ;;  %1873 = vmatmul.bf16.gmra.mxu3 %v5223_v8 }
 0x12e   : > { %1887 = vmatmul.bf16.vlgmr.msra.gmra.mxu0 %v5209_v63  ;;  %1906 = vmatmul.bf16.vlgmr.msra.gmra.mxu1 %v5211_v0 }
 0x12f   : > { %1925 = vmatmul.bf16.vlgmr.msra.gmra.mxu2 %v5209_v63  ;;  %1944 = vmatmul.bf16.vlgmr.msra.gmra.mxu3 %v5211_v0 }
 0x13e   : > { %1892 = vmatmul.bf16.gmra.mxu0 %v5221_v7  ;;  %1911 = vmatmul.bf16.gmra.mxu1 %v5223_v8 }
 0x13f   : > { %1930 = vmatmul.bf16.gmra.mxu2 %v5221_v7  ;;  %1949 = vmatmul.bf16.gmra.mxu3 %v5223_v8 }
 0x14b   : > { %v1660_v33 = vpop.f32.mrf.mxu0  ;;  %v1679_v35 = vpop.f32.mrf.mxu1 }
 0x14c   : > { %v1680_v36 = vadd.f32 %v1679_v35, %v1660_v33 }
 0x152   : > { %v1698_v34 = vpop.f32.mrf.mxu2  ;;  %v1717_v37 = vpop.f32.mrf.mxu3 }
 0x153   : > { %v1718_v38 = vadd.f32 %v1717_v37, %v1698_v34  ;;  %v5253_v39 = vpop.f32.mrf.mxu0  ;;  %v5255_v40 = vpop.f32.mrf.mxu1  ;;  %v4065_v34 = vld [vmem:[#allocation5 + $0x60] sm:$0xf]  ;;  %v4637_v37 = vld [vmem:[#allocation5 + $0x64] sm:$0xf0] }
 0x15a   : > { %v5257_v63 = vpop.f32.mrf.mxu2  ;;  %v5259_v0 = vpop.f32.mrf.mxu3 }
 0x15b   : > { %v1665_v41 = vpop.f32.mrf.mxu0  ;;  %v1684_v42 = vpop.f32.mrf.mxu1 }
 0x15c   : > { %v1685_v43 = vadd.f32 %v1684_v42, %v1665_v41 }
 0x162   : > { %v1703_v7 = vpop.f32.mrf.mxu2  ;;  %v1722_v44 = vpop.f32.mrf.mxu3 }
 0x163   : > { %v5261_v8 = vadd.f32 %v1722_v44, %v1703_v7  ;;  %v1667_v45 = vpop.f32.mrf.mxu0  ;;  %v1686_v46 = vpop.f32.mrf.mxu1  ;;  %v4067_v7 = vld [vmem:[#allocation5 + $0x68] sm:$0xf0] }
 0x164   : > { %v1687_v47 = vadd.f32 %v1686_v46, %v1667_v45  ;;  %v4654_v45 = vld [vmem:[#allocation5 + $0xf4] sm:$0xf]  ;;  %v4139_v46 = vld [vmem:[#allocation5 + $0xf8] sm:$0xf0] }
 0x16a   : > { %v1705_v48 = vpop.f32.mrf.mxu2  ;;  %v1724_v49 = vpop.f32.mrf.mxu3 }
 0x16b   : > { %v1725_v50 = vadd.f32 %v1724_v49, %v1705_v48  ;;  %v1736_v51 = vpop.f32.mrf.mxu0  ;;  %v1755_v52 = vpop.f32.mrf.mxu1  ;;  %v4142_v49 = vor.u32 %v4654_v45, %v4139_v46  ;;  %v4115_v45 = vld [vmem:[#allocation5 + $0xc8] sm:$0xf0] }
 0x16c   : > { %v1756_v53 = vadd.f32 %v1755_v52, %v1736_v51  ;;  %v4137_v51 = vld [vmem:[#allocation5 + $0xf0] sm:$0xf]  ;;  %v4655_v52 = vld [vmem:[#allocation5 + $0xf4] sm:$0xf0] }
 0x16d   : > { %2352 = vmatpush.bf16.msrb.mxu3 %v4142_v49 }
 0x16e   : > { %v1964_v61 = vrot.slane %v1756_v53, 2 }
 0x172   : > { %v1774_v54 = vpop.f32.mrf.mxu2  ;;  %v1793_v55 = vpop.f32.mrf.mxu3 }
 0x173   : > { %v1794_v57 = vadd.f32 %v1793_v55, %v1774_v54  ;;  %v1738_v58 = vpop.f32.mrf.mxu0  ;;  %v1757_v59 = vpop.f32.mrf.mxu1  ;;  %v4138_v54 = vor.u32 %v4655_v52, %v4137_v51  ;;  %v4057_v55 = vld [vmem:[#allocation5 + $0x50] sm:$0xf]  ;;  %v4113_v51 = vld [vmem:[#allocation5 + $0xc0] sm:$0xf]  ;;  %v4649_v52 = vld [vmem:[#allocation5 + $0xc4] sm:$0xf0] }
 0x174   : > { %v5263_v60 = vadd.f32 %v1757_v59, %v1738_v58  ;;  %v4634_v58 = vld [vmem:[#allocation5 + $0x54] sm:$0xf] }
 0x175   : > { %v1967_v20 = vrot.slane %v1794_v57, 2  ;;  %v4635_v57 = vld [vmem:[#allocation5 + $0x54] sm:$0xf0]  ;;  %2314 = vmatpush.bf16.msrb.mxu1 %v4138_v54  ;;  %v4114_v54 = vor.u32 %v4649_v52, %v4113_v51  ;;  %v4642_v52 = vld [vmem:[#allocation5 + $0x94] sm:$0xf] }
 0x176   : > { %v1965_v62 = vrot.slane %v5263_v60, 2  ;;  %v4058_v59 = vor.u32 %v4635_v57, %v4057_v55  ;;  %v4033_v55 = vld [vmem:[#allocation5 + $0x20] sm:$0xf]  ;;  %v4629_v57 = vld [vmem:[#allocation5 + $0x24] sm:$0xf0] }
 0x178   : > { %v1966_v1 = vsel %vm1963_vm3, %v1964_v61, %v1965_v62  ;;  %v4059_v61 = vld [vmem:[#allocation5 + $0x58] sm:$0xf0] }
 0x179   : > { %v5269_v2 = vadd.f32 %v1966_v1, %v1680_v36 }
 0x17a   : > { %v1776_v3 = vpop.f32.mrf.mxu2  ;;  %v1795_v4 = vpop.f32.mrf.mxu3 }
 0x17b   : > { %v5271_v5 = vadd.f32 %v1795_v4, %v1776_v3  ;;  %v1741_v6 = vpop.f32.mrf.mxu0  ;;  %v1760_v56 = vpop.f32.mrf.mxu1  ;;  %v4652_v4 = vld [vmem:[#allocation5 + $0xe4] sm:$0xf] }
 0x17c   : > { %v5279_v12 = vadd.f32 %v1760_v56, %v1741_v6  ;;  %v4131_v6 = vld [vmem:[#allocation5 + $0xe8] sm:$0xf0]  ;;  %v4129_v56 = vld [vmem:[#allocation5 + $0xe0] sm:$0xf] }
 0x17d   : > { %v1968_v9 = vrot.slane %v5271_v5, 2 }
 0x17e   : > { %v1970_v18 = vrot.slane %v5279_v12, 2 }
 0x17f   : > { %v1969_v10 = vsel %vm1963_vm3, %v1967_v20, %v1968_v9 }
 0x180   : > { %v5277_v11 = vadd.f32 %v1969_v10, %v1718_v38  ;;  %v4636_v38 = vld [vmem:[#allocation5 + $0x64] sm:$0xf]  ;;  %v4134_v10 = vor.u32 %v4652_v4, %v4131_v6  ;;  %v4646_v4 = vld [vmem:[#allocation5 + $0xb4] sm:$0xf]  ;;  %v4107_v6 = vld [vmem:[#allocation5 + $0xb8] sm:$0xf0] }
 0x181   : > { %v4070_v44 = vor.u32 %v4636_v38, %v4067_v7  ;;  %v4043_v38 = vld [vmem:[#allocation5 + $0x38] sm:$0xf0] }
 0x182   : > { %v1779_v13 = vpop.f32.mrf.mxu2  ;;  %v1798_v14 = vpop.f32.mrf.mxu3  ;;  %2353 = vmatpush.bf16.msrb.mxu3 %v4134_v10  ;;  %v4105_v10 = vld [vmem:[#allocation5 + $0xb0] sm:$0xf] }
 0x183   : > { %v1743_v15 = vpop.f32.mrf.mxu0  ;;  %v1762_v16 = vpop.f32.mrf.mxu1  ;;  %v5287_v26 = vadd.f32 %v1798_v14, %v1779_v13  ;;  %2334 = vmatpush.bf16.msrb.mxu2 %v4070_v44  ;;  %v4653_v13 = vld [vmem:[#allocation5 + $0xe4] sm:$0xf0]  ;;  %v4648_v44 = vld [vmem:[#allocation5 + $0xc4] sm:$0xf] }
 0x184   : > { %v1763_v17 = vadd.f32 %v1762_v16, %v1743_v15  ;;  %v4130_v14 = vor.u32 %v4653_v13, %v4129_v56  ;;  %v4049_v15 = vld [vmem:[#allocation5 + $0x40] sm:$0xf]  ;;  %v4633_v16 = vld [vmem:[#allocation5 + $0x44] sm:$0xf0]  ;;  %v4118_v49 = vor.u32 %v4648_v44, %v4115_v45  ;;  %v4110_v56 = vor.u32 %v4646_v4, %v4107_v6  ;;  %v4647_v13 = vld [vmem:[#allocation5 + $0xb4] sm:$0xf0] }
 0x185   : > { %v1972_v41 = vrot.slane %v5287_v26, 2  ;;  %v4624_v44 = vld [vmem:[#allocation5 + $0x4] sm:$0xf]  ;;  %v4083_v6 = vld [vmem:[#allocation5 + $0x88] sm:$0xf0] }
 0x186   : > { %v1974_v19 = vrot.slane %v1763_v17, 2  ;;  %v4632_v17 = vld [vmem:[#allocation5 + $0x44] sm:$0xf]  ;;  %2315 = vmatpush.bf16.msrb.mxu1 %v4130_v14  ;;  %2354 = vmatpush.bf16.msrb.mxu3 %v4126_v28  ;;  %v4106_v14 = vor.u32 %v4647_v13, %v4105_v10 }
 0x187   : > { %v4644_v28 = vld [vmem:[#allocation5 + $0xa4] sm:$0xf] }
 0x188   : > { %v1975_v21 = vsel %vm1963_vm3, %v1970_v18, %v1974_v19  ;;  %v5285_v22 = vadd.f32 %v1974_v19, %v1687_v47  ;;  %v4050_v19 = vor.u32 %v4633_v16, %v4049_v15  ;;  %v4025_v15 = vld [vmem:[#allocation5 + $0x10] sm:$0xf]  ;;  %v4627_v16 = vld [vmem:[#allocation5 + $0x14] sm:$0xf0]  ;;  %v4640_v4 = vld [vmem:[#allocation5 + $0x84] sm:$0xf] }
 0x189   : > { %v5289_v27 = vadd.f32 %v1975_v21, %v1685_v43  ;;  %v4066_v43 = vor.u32 %v4637_v37, %v4065_v34  ;;  %v4051_v21 = vld [vmem:[#allocation5 + $0x48] sm:$0xf0]  ;;  %v4630_v34 = vld [vmem:[#allocation5 + $0x34] sm:$0xf] }
 0x18a   : > { %v1781_v30 = vpop.f32.mrf.mxu2  ;;  %v1800_v31 = vpop.f32.mrf.mxu3  ;;  %v4054_v23 = vor.u32 %v4632_v17, %v4051_v21  ;;  %v4046_v7 = vor.u32 %v4630_v34, %v4043_v38  ;;  %2355 = vmatpush.bf16.msrb.mxu3 %v4118_v49  ;;  %v4026_v17 = vor.u32 %v4627_v16, %v4025_v15  ;;  %v4027_v21 = vld [vmem:[#allocation5 + $0x18] sm:$0xf0]  ;;  %v4645_v34 = vld [vmem:[#allocation5 + $0xa4] sm:$0xf0]  ;;  %v4017_v38 = vld [vmem:[#allocation5] sm:$0xf] }
 0x18b   : > { %v1801_v33 = vadd.f32 %v1800_v31, %v1781_v30  ;;  %v5291_v35 = vpop.f32.mrf.mxu0  ;;  %v5293_v36 = vpop.f32.mrf.mxu1  ;;  %2296 = vmatpush.bf16.msrb.mxu0 %v4066_v43  ;;  %v4651_v30 = vld [vmem:[#allocation5 + $0xd4] sm:$0xf0]  ;;  %v4019_v49 = vld [vmem:[#allocation5 + $0x8] sm:$0xf0]  ;;  %v4641_v15 = vld [vmem:[#allocation5 + $0x84] sm:$0xf0] }
 0x18c   : > { %v4122_v31 = vor.u32 %v4651_v30, %v4121_v29  ;;  %v4099_v29 = vld [vmem:[#allocation5 + $0xa8] sm:$0xf0]  ;;  %v4097_v30 = vld [vmem:[#allocation5 + $0xa0] sm:$0xf]  ;;  %v4022_v51 = vor.u32 %v4624_v44, %v4019_v49 }
 0x18d   : > { %v1976_v42 = vrot.slane %v1801_v33, 2  ;;  %v4631_v33 = vld [vmem:[#allocation5 + $0x34] sm:$0xf0] }
 0x18e   : > { %v4042_v37 = vor.u32 %v4631_v33, %v4041_v32  ;;  %2316 = vmatpush.bf16.msrb.mxu1 %v4122_v31  ;;  %2356 = vmatpush.bf16.msrb.mxu3 %v4110_v56  ;;  %v4102_v33 = vor.u32 %v4644_v28, %v4099_v29  ;;  %v4081_v56 = vld [vmem:[#allocation5 + $0x80] sm:$0xf] }
 0x18f   : > { %v1977_v47 = vsel %vm1963_vm3, %v1972_v41, %v1976_v42  ;;  %v5299_v48 = vadd.f32 %v1976_v42, %v1725_v50  ;;  %v4062_v50 = vor.u32 %v4634_v58, %v4059_v61  ;;  %2297 = vmatpush.bf16.msrb.mxu0 %v4058_v59  ;;  %v4628_v58 = vld [vmem:[#allocation5 + $0x24] sm:$0xf]  ;;  %v4034_v59 = vor.u32 %v4629_v57, %v4033_v55  ;;  %v4035_v61 = vld [vmem:[#allocation5 + $0x28] sm:$0xf0]  ;;  %v4089_v57 = vld [vmem:[#allocation5 + $0x90] sm:$0xf] }
 0x190   : > { %v5302_v53 = vadd.f32 %v1977_v47, %v5261_v8  ;;  %v4082_v16 = vor.u32 %v4641_v15, %v4081_v56 }
 0x191   : > { %2335 = vmatpush.bf16.msrb.mxu2 %v4062_v50  ;;  %v4038_v50 = vor.u32 %v4628_v58, %v4035_v61  ;;  %v4643_v58 = vld [vmem:[#allocation5 + $0x94] sm:$0xf0] }
 0x192   : > { %v5304_v1 = vpop.f32.mrf.mxu2  ;;  %v5306_v3 = vpop.f32.mrf.mxu3  ;;  %2317 = vmatpush.bf16.msrb.mxu1 %v4114_v54  ;;  %2357 = vmatpush.bf16.msrb.mxu3 %v4102_v33  ;;  %v4091_v54 = vld [vmem:[#allocation5 + $0x98] sm:$0xf0] }
 0x193   : > { %v5308_v20 = vpop.f32.mrf.mxu0  ;;  %v5310_v8 = vpop.f32.mrf.mxu1  ;;  %2298 = vmatpush.bf16.msrb.mxu0 %v4050_v19  ;;  %v4626_v19 = vld [vmem:[#allocation5 + $0x14] sm:$0xf]  ;;  %v4094_v55 = vor.u32 %v4642_v52, %v4091_v54 }
 0x194   : > { %v4030_v25 = vor.u32 %v4626_v19, %v4027_v21  ;;  %v1832_v19 = vadd.f32 %v5293_v36, %v5291_v35  ;;  %v1971_v36 = vsel %vm1963_vm3, %v1965_v62, %v1970_v18 }
 0x195   : > { %2336 = vmatpush.bf16.msrb.mxu2 %v4054_v23 }
 0x196   : > { %2318 = vmatpush.bf16.msrb.mxu1 %v4106_v14  ;;  %2358 = vmatpush.bf16.msrb.mxu3 %v4094_v55  ;;  %v4086_v14 = vor.u32 %v4640_v4, %v4083_v6 }
 0x197   : > { %2299 = vmatpush.bf16.msrb.mxu0 %v4042_v37  ;;  %v4098_v37 = vor.u32 %v4645_v34, %v4097_v30 }
 0x199   : > { %2337 = vmatpush.bf16.msrb.mxu2 %v4046_v7  ;;  %v4625_v7 = vld [vmem:[#allocation5 + $0x4] sm:$0xf0] }
 0x19a   : > { %v5312_v42 = vpop.f32.mrf.mxu2  ;;  %v5314_v43 = vpop.f32.mrf.mxu3  ;;  %v4018_v45 = vor.u32 %v4625_v7, %v4017_v38  ;;  %2319 = vmatpush.bf16.msrb.mxu1 %v4098_v37  ;;  %2359 = vmatpush.bf16.msrb.mxu3 %v4086_v14  ;;  %v2003_v38 = vrot.slane %v1832_v19, 4 }
 0x19b   : > { %v5316_v46 = vpop.f32.mrf.mxu0  ;;  %v5318_v47 = vpop.f32.mrf.mxu1  ;;  %2300 = vmatpush.bf16.msrb.mxu0 %v4034_v59  ;;  %v4090_v59 = vor.u32 %v4643_v58, %v4089_v57 }
 0x19c   : > { %v1837_v33 = vadd.f32 %v5318_v47, %v5316_v46  ;;  %v1870_v46 = vadd.f32 %v5306_v3, %v5304_v1  ;;  %v1682_v47 = vadd.f32 %v5255_v40, %v5253_v39 }
 0x19d   : > { %2338 = vmatpush.bf16.msrb.mxu2 %v4038_v50 }
 0x19e   : > { %2320 = vmatpush.bf16.msrb.mxu1 %v4090_v59  ;;  %v1988_v52 = vadd.f32 %v1971_v36, %v1682_v47  ;;  %v2006_v54 = vrot.slane %v1870_v46, 4 }
 0x19f   : > { %2301 = vmatpush.bf16.msrb.mxu0 %v4026_v17  ;;  %v1834_v17 = vadd.f32 %v5310_v8, %v5308_v20  ;;  %v1872_v20 = vadd.f32 %v5314_v43, %v5312_v42  ;;  %v2009_v8 = vrot.slane %v1837_v33, 4  ;;  %v2071_v42 = vld [vmem:[%s5501_s4] sm:$0x3] }
 0x1a0   : > { %v2073_v57 = vperm.slane %v2071_v42, 0 }
 0x1a1   : > { %2339 = vmatpush.bf16.msrb.mxu2 %v4030_v25  ;;  %v2004_v28 = vrot.slane %v1834_v17, 4 }
 0x1a2   : > { %v5320_v23 = vpop.f32.mrf.mxu2  ;;  %v5322_v24 = vpop.f32.mrf.mxu3  ;;  %2321 = vmatpush.bf16.msrb.mxu1 %v4082_v16 }
 0x1a3   : > { %v5324_v31 = vpop.f32.mrf.mxu0  ;;  %v5326_v32 = vpop.f32.mrf.mxu1  ;;  %2302 = vmatpush.bf16.msrb.mxu0 %v4018_v45  ;;  %v2005_v44 = vsel %vm2002_vm4, %v2003_v38, %v2004_v28  ;;  %v1875_v60 = vadd.f32 %v5322_v24, %v5320_v23  ;;  %v2010_v39 = vsel %vm2002_vm4, %v2004_v28, %v2009_v8  ;;  %v1973_v23 = vsel %vm1963_vm3, %v1968_v9, %v1972_v41 }
 0x1a4   : > { %v2025_v45 = vadd.f32 %v2005_v44, %v5269_v2  ;;  %v1839_v40 = vadd.f32 %v5326_v32, %v5324_v31  ;;  %v2027_v4 = vadd.f32 %v2010_v39, %v1988_v52  ;;  %v1720_v31 = vadd.f32 %v5259_v0, %v5257_v63 }
 0x1a5   : > { %2340 = vmatpush.bf16.msrb.mxu2 %v4022_v51  ;;  %v2007_v51 = vrot.slane %v1872_v20, 4  ;;  %v2011_v6 = vrot.slane %v1875_v60, 4 }
 0x1a6   : > { %v2013_v32 = vrot.slane %v1839_v40, 4  ;;  %v1989_v15 = vadd.f32 %v1973_v23, %v1720_v31 }
 0x1a7   : > { %v2008_v59 = vsel %vm2002_vm4, %v2006_v54, %v2007_v51  ;;  %v2012_v16 = vsel %vm2002_vm4, %v2007_v51, %v2011_v6 }
 0x1a8   : > { %v2026_v5 = vadd.f32 %v2008_v59, %v5277_v11  ;;  %v2028_v11 = vadd.f32 %v2012_v16, %v1989_v15  ;;  %v2031_v38 = vadd.f32 %v2013_v32, %v5285_v22  ;;  %v4193_v16 = vld [vmem:[#allocation7 + $0x60] sm:$0xf] }
 0x1aa   : > { %v5328_v61 = vpop.f32.mrf.mxu2  ;;  %v5330_v50 = vpop.f32.mrf.mxu3 }
 0x1ab   : > { %v1888_v10 = vpop.f32.mrf.mxu0  ;;  %v1907_v13 = vpop.f32.mrf.mxu1  ;;  %v1877_v17 = vadd.f32 %v5330_v50, %v5328_v61 }
 0x1ac   : > { %v1908_v34 = vadd.f32 %v1907_v13, %v1888_v10 }
 0x1ad   : > { %v2015_v20 = vrot.slane %v1877_v17, 4  ;;  %v4669_v17 = vld [vmem:[#allocation7 + $0x68] sm:$0xf0] }
 0x1ae   : > { %v2041_v35 = vrot.slane %v1908_v34, 6 }
 0x1af   : > { %v2016_v22 = vsel %vm2002_vm4, %v2011_v6, %v2015_v20  ;;  %v4217_v6 = vld [vmem:[#allocation7 + $0x90] sm:$0xf] }
 0x1b0   : > { %v2030_v52 = vadd.f32 %v2016_v22, %v5302_v53 }
 0x1b2   : > { %v1926_v21 = vpop.f32.mrf.mxu2  ;;  %v1945_v25 = vpop.f32.mrf.mxu3 }
 0x1b3   : > { %v1890_v29 = vpop.f32.mrf.mxu0  ;;  %v1909_v30 = vpop.f32.mrf.mxu1  ;;  %v1946_v62 = vadd.f32 %v1945_v25, %v1926_v21  ;;  %v2014_v25 = vsel %vm2002_vm4, %v2009_v8, %v2013_v32  ;;  %v4325_v32 = vld [vmem:[#allocation7 + $0x168] sm:$0xf] }
 0x1b4   : > { %v1910_v37 = vadd.f32 %v1909_v30, %v1890_v29  ;;  %v2074_v29 = vperm.slane %v2071_v42, 1  ;;  %v2029_v44 = vadd.f32 %v2014_v25, %v5289_v27  ;;  %v4301_v25 = vld [vmem:[#allocation7 + $0x138] sm:$0xf] }
 0x1b5   : > { %v2044_v56 = vrot.slane %v1946_v62, 6 }
 0x1b6   : > { %v2042_v7 = vrot.slane %v1910_v37, 6 }
 0x1b8   : > { %v2043_v49 = vsel %vm749_vm0, %v2041_v35, %v2042_v7 }
 0x1b9   : > { %v2063_v55 = vadd.f32 %v2043_v49, %v2025_v45 }
 0x1ba   : > { %v1928_v43 = vpop.f32.mrf.mxu2  ;;  %v1947_v12 = vpop.f32.mrf.mxu3 }
 0x1bb   : > { %v1948_v18 = vadd.f32 %v1947_v12, %v1928_v43  ;;  %v1893_v1 = vpop.f32.mrf.mxu0  ;;  %v1912_v3 = vpop.f32.mrf.mxu1  ;;  %v2077_v13 = vadd.f32 %v2073_v57, %v2063_v55 }
 0x1bc   : > { %v1913_v2 = vadd.f32 %v1912_v3, %v1893_v1 }
 0x1bd   : > { %v2045_v58 = vrot.slane %v1948_v18, 6  ;;  %v2085_v33 = vmax.f32 %v2077_v13, 0.0  ;;  %v2032_v18 = vadd.f32 %v2015_v20, %v5299_v48  ;;  %v4229_v48 = vld [vmem:[#allocation7 + $0xa8] sm:$0xf] }
 0x1be   : > { %v2047_v24 = vrot.slane %v1913_v2, 6 }
 0x1bf   : > { %v2046_v14 = vsel %vm749_vm0, %v2044_v56, %v2045_v58  ;;  %v4675_v56 = vld [vmem:[#allocation7 + $0x98] sm:$0xf0] }
 0x1c0   : > { %v2048_v10 = vsel %vm749_vm0, %v2042_v7, %v2047_v24  ;;  %v2064_v28 = vadd.f32 %v2046_v14, %v2026_v5  ;;  %v4218_v31 = vor.u32 %v4675_v56, %v4217_v6  ;;  %v4205_v14 = vld [vmem:[#allocation7 + $0x78] sm:$0xf]  ;;  %v4313_v5 = vld [vmem:[#allocation7 + $0x150] sm:$0xf] }
 0x1c1   : > { %v2065_v26 = vadd.f32 %v2048_v10, %v2027_v4  ;;  %v4678_v4 = vld [vmem:[#allocation7 + $0xb0] sm:$0xf0] }
 0x1c2   : > { %v1931_v9 = vpop.f32.mrf.mxu2  ;;  %v1950_v41 = vpop.f32.mrf.mxu3  ;;  %v2078_v35 = vadd.f32 %v2074_v29, %v2064_v28  ;;  %v4230_v53 = vor.u32 %v4678_v4, %v4229_v48  ;;  %v4702_v10 = vld [vmem:[#allocation7 + $0x170] sm:$0xf0]  ;;  %v4696_v28 = vld [vmem:[#allocation7 + $0x140] sm:$0xf0]  ;;  %v4665_v48 = vld [vmem:[#allocation7 + $0x4c] sm:$0xf] }
 0x1c3   : > { %v2079_v19 = vadd.f32 %v2073_v57, %v2065_v26  ;;  %v1951_v21 = vadd.f32 %v1950_v41, %v1931_v9  ;;  %v1895_v63 = vpop.f32.mrf.mxu0  ;;  %v1914_v0 = vpop.f32.mrf.mxu1  ;;  %v4326_v13 = vor.u32 %v4702_v10, %v4325_v32  ;;  %v4672_v26 = vld [vmem:[#allocation7 + $0x80] sm:$0xf0]  ;;  %v4699_v9 = vld [vmem:[#allocation7 + $0x158] sm:$0xf0]  ;;  %v4183_v4 = vld [vmem:[#allocation7 + $0x54] sm:$0xf0] }
 0x1c4   : > { %v1915_v30 = vadd.f32 %v1914_v0, %v1895_v63  ;;  %v2086_v51 = vmax.f32 %v2078_v35, 0.0  ;;  %2739 = vmatpush.bf16.msra.mxu0 %v4230_v53  ;;  %v4206_v15 = vor.u32 %v4672_v26, %v4205_v14  ;;  %v4314_v41 = vor.u32 %v4699_v9, %v4313_v5  ;;  %v4231_v63 = vld [vmem:[#allocation7 + $0xb4] sm:$0xf0]  ;;  %v4237_v53 = vld [vmem:[#allocation7 + $0xb0] sm:$0xf] }
 0x1c5   : > { %v2087_v34 = vmax.f32 %v2079_v19, 0.0  ;;  %v2049_v37 = vrot.slane %v1951_v21, 6  ;;  %2752 = vmatpush.bf16.msra.mxu1 %v4326_v13  ;;  %v4194_v19 = vor.u32 %v4669_v17, %v4193_v16  ;;  %v4677_v21 = vld [vmem:[#allocation7 + $0xac] sm:$0xf]  ;;  %v4186_v56 = vor.u32 %v4665_v48, %v4183_v4  ;;  %v4253_v32 = vld [vmem:[#allocation7 + $0xd8] sm:$0xf] }
 0x1c6   : > { %v2051_v7 = vrot.slane %v1915_v30, 6  ;;  %v4234_v0 = vor.u32 %v4677_v21, %v4231_v63  ;;  %v4181_v30 = vld [vmem:[#allocation7 + $0x48] sm:$0xf]  ;;  %v4684_v10 = vld [vmem:[#allocation7 + $0xe0] sm:$0xf0] }
 0x1c7   : > { %v2050_v61 = vsel %vm749_vm0, %v2045_v58, %v2049_v37  ;;  %v2093_v50 = vpack.c.bf16 %v2087_v34, %v2085_v33  ;;  %v4666_v33 = vld [vmem:[#allocation7 + $0x50] sm:$0xf0]  ;;  %v4254_v26 = vor.u32 %v4684_v10, %v4253_v32  ;;  %v4291_v5 = vld [vmem:[#allocation7 + $0x12c] sm:$0xf0]  ;;  %v4171_v17 = vld [vmem:[#allocation7 + $0x3c] sm:$0xf0] }
 0x1c8   : > { %v2066_v36 = vadd.f32 %v2050_v61, %v2028_v11  ;;  %v2052_v8 = vsel %vm749_vm0, %v2047_v24, %v2051_v7  ;;  %v2069_v46 = vadd.f32 %v2051_v7, %v2031_v38  ;;  %2740 = vmatpush.bf16.msra.mxu0 %v4218_v31  ;;  %2765 = vmatpush.bf16.msra.mxu2 %v4234_v0  ;;  %v4219_v11 = vld [vmem:[#allocation7 + $0x9c] sm:$0xf0]  ;;  %v4701_v61 = vld [vmem:[#allocation7 + $0x16c] sm:$0xf]  ;;  %v4679_v31 = vld [vmem:[#allocation7 + $0xb8] sm:$0xf0] }
 0x1c9   : > { %2303 = vmatmul.bf16.vlgmr.msrb.gmra.mxu0 %v2093_v50  ;;  %2341 = vmatmul.bf16.vlgmr.msrb.gmra.mxu2 %v2093_v50  ;;  %v2067_v47 = vadd.f32 %v2052_v8, %v2029_v44  ;;  %v4182_v34 = vor.u32 %v4666_v33, %v4181_v30  ;;  %v4289_v7 = vld [vmem:[#allocation7 + $0x120] sm:$0xf]  ;;  %v4693_v44 = vld [vmem:[#allocation7 + $0x128] sm:$0xf0]  ;;  %v4327_v50 = vld [vmem:[#allocation7 + $0x174] sm:$0xf0]  ;;  %v4238_v14 = vor.u32 %v4679_v31, %v4237_v53 }
 0x1ca   : > { %v2080_v45 = vadd.f32 %v2074_v29, %v2066_v36  ;;  %v1933_v49 = vpop.f32.mrf.mxu2  ;;  %v1952_v42 = vpop.f32.mrf.mxu3  ;;  %v2083_v43 = vadd.f32 %v2073_v57, %v2069_v46  ;;  %2753 = vmatpush.bf16.msra.mxu1 %v4314_v41  ;;  %v4290_v20 = vor.u32 %v4693_v44, %v4289_v7  ;;  %v4330_v35 = vor.u32 %v4701_v61, %v4327_v50  ;;  %v4169_v36 = vld [vmem:[#allocation7 + $0x30] sm:$0xf]  ;;  %v4663_v8 = vld [vmem:[#allocation7 + $0x38] sm:$0xf0]  ;;  %v4662_v16 = vld [vmem:[#allocation7 + $0x34] sm:$0xf] }
 0x1cb   : > { %v1953_v12 = vadd.f32 %v1952_v42, %v1933_v49  ;;  %v2081_v27 = vadd.f32 %v2073_v57, %v2067_v47  ;;  %v4170_v46 = vor.u32 %v4663_v8, %v4169_v36  ;;  %v4671_v47 = vld [vmem:[#allocation7 + $0x7c] sm:$0xf]  ;;  %v4277_v42 = vld [vmem:[#allocation7 + $0x108] sm:$0xf]  ;;  %v4174_v21 = vor.u32 %v4662_v16, %v4171_v17  ;;  %v4676_v63 = vld [vmem:[#allocation7 + $0xa0] sm:$0xf0] }
 0x1cc   : > { %v2088_v60 = vmax.f32 %v2080_v45, 0.0  ;;  %v2091_v62 = vmax.f32 %v2083_v43, 0.0  ;;  %2741 = vmatpush.bf16.msra.mxu0 %v4206_v15  ;;  %v4207_v45 = vld [vmem:[#allocation7 + $0x84] sm:$0xf0]  ;;  %2778 = vmatpush.bf16.msra.mxu3 %v4330_v35  ;;  %v4690_v43 = vld [vmem:[#allocation7 + $0x110] sm:$0xf0] }
 0x1cd   : > { %v2053_v1 = vrot.slane %v1953_v12, 6  ;;  %v2089_v3 = vmax.f32 %v2081_v27, 0.0  ;;  %v4210_v49 = vor.u32 %v4671_v47, %v4207_v45  ;;  %v4278_v22 = vor.u32 %v4690_v43, %v4277_v42  ;;  %v4698_v12 = vld [vmem:[#allocation7 + $0x154] sm:$0xf]  ;;  %v4315_v27 = vld [vmem:[#allocation7 + $0x15c] sm:$0xf0] }
 0x1ce   : > { %v2094_v39 = vpack.c.bf16 %v2088_v60, %v2086_v51  ;;  %v4318_v60 = vor.u32 %v4698_v12, %v4315_v27  ;;  %v4692_v15 = vld [vmem:[#allocation7 + $0x124] sm:$0xf]  ;;  %v4241_v0 = vld [vmem:[#allocation7 + $0xc0] sm:$0xf]  ;;  %v4279_v30 = vld [vmem:[#allocation7 + $0x114] sm:$0xf0] }
 0x1cf   : > { %v2054_v40 = vsel %vm749_vm0, %v2049_v37, %v2053_v1  ;;  %v2070_v2 = vadd.f32 %v2053_v1, %v2032_v18  ;;  %v2095_v54 = vpack.c.bf16 %v2091_v62, %v2089_v3  ;;  %v4674_v37 = vld [vmem:[#allocation7 + $0x94] sm:$0xf]  ;;  %v4157_v62 = vld [vmem:[#allocation7 + $0x18] sm:$0xf]  ;;  %v4660_v18 = vld [vmem:[#allocation7 + $0x20] sm:$0xf0]  ;;  %v4294_v41 = vor.u32 %v4692_v15, %v4291_v5 }
 0x1d0   : > { %2322 = vmatmul.bf16.vlgmr.msrb.gmra.mxu1 %v2094_v39  ;;  %2360 = vmatmul.bf16.vlgmr.msrb.gmra.mxu3 %v2094_v39  ;;  %v2068_v55 = vadd.f32 %v2054_v40, %v2030_v52  ;;  %v4222_v38 = vor.u32 %v4674_v37, %v4219_v11  ;;  %v4158_v1 = vor.u32 %v4660_v18, %v4157_v62  ;;  %v4668_v3 = vld [vmem:[#allocation7 + $0x64] sm:$0xf]  ;;  %v4195_v52 = vld [vmem:[#allocation7 + $0x6c] sm:$0xf0]  ;;  %v4703_v11 = vld [vmem:[#allocation7 + $0x178] sm:$0xf0] }
 0x1d1   : > { %v2084_v58 = vadd.f32 %v2074_v29, %v2070_v2  ;;  %2742 = vmatpush.bf16.msra.mxu0 %v4194_v19  ;;  %2779 = vmatpush.bf16.msra.mxu3 %v4318_v60  ;;  %v4198_v39 = vor.u32 %v4668_v3, %v4195_v52  ;;  %v4265_v40 = vld [vmem:[#allocation7 + $0xf0] sm:$0xf]  ;;  %v4687_v2 = vld [vmem:[#allocation7 + $0xf8] sm:$0xf0]  ;;  %v4225_v19 = vld [vmem:[#allocation7 + $0x98] sm:$0xf] }
 0x1d2   : > { %v2082_v23 = vadd.f32 %v2074_v29, %v2068_v55  ;;  %v4302_v29 = vor.u32 %v4696_v28, %v4301_v25  ;;  %2766 = vmatpush.bf16.msra.mxu2 %v4222_v38  ;;  %v4695_v55 = vld [vmem:[#allocation7 + $0x13c] sm:$0xf]  ;;  %v4226_v25 = vor.u32 %v4676_v63, %v4225_v19  ;;  %v4681_v28 = vld [vmem:[#allocation7 + $0xc8] sm:$0xf0]  ;;  %v4333_v37 = vld [vmem:[#allocation7 + $0x170] sm:$0xf] }
 0x1d3   : > { %v2092_v57 = vmax.f32 %v2084_v58, 0.0  ;;  %v4303_v58 = vld [vmem:[#allocation7 + $0x144] sm:$0xf0]  ;;  %v4242_v33 = vor.u32 %v4681_v28, %v4241_v0  ;;  %v4334_v7 = vor.u32 %v4703_v11, %v4333_v37  ;;  %v4659_v44 = vld [vmem:[#allocation7 + $0x1c] sm:$0xf]  ;;  %v4980_v32 = vmov 25.0  }
 0x1d4   : > { %v2090_v24 = vmax.f32 %v2082_v23, 0.0  ;;  %2754 = vmatpush.bf16.msra.mxu1 %v4302_v29  ;;  %v4306_v23 = vor.u32 %v4695_v55, %v4303_v58  ;;  %v4689_v29 = vld [vmem:[#allocation7 + $0x10c] sm:$0xf]  ;;  %v4213_v61 = vld [vmem:[#allocation7 + $0x80] sm:$0xf]  ;;  %4796 = vrcp.f32 %v4980_v32 }
 0x1d5   : > { %2743 = vmatpush.bf16.msra.mxu0 %v4182_v34  ;;  %v4282_v34 = vor.u32 %v4689_v29, %v4279_v30  ;;  %v2129_v50 = vld [vmem:[%s5503_s6] sm:$0x3]  ;;  %v4673_v8 = vld [vmem:[#allocation7 + $0x88] sm:$0xf0]  ;;  %v4686_v45 = vld [vmem:[#allocation7 + $0xf4] sm:$0xf] }
 0x1d6   : > { %v2096_v59 = vpack.c.bf16 %v2092_v57, %v2090_v24  ;;  %2767 = vmatpush.bf16.msra.mxu2 %v4210_v49  ;;  %v4145_v57 = vld [vmem:[#allocation7] sm:$0xf]  ;;  %v4657_v24 = vld [vmem:[#allocation7 + $0x8] sm:$0xf0]  ;;  %2780 = vmatpush.bf16.msra.mxu3 %v4306_v23  ;;  %v4214_v47 = vor.u32 %v4673_v8, %v4213_v61  ;;  %v4321_v42 = vld [vmem:[#allocation7 + $0x158] sm:$0xf] }
 0x1d7   : > { %v4267_v49 = vld [vmem:[#allocation7 + $0xfc] sm:$0xf0]  ;;  %v4656_v60 = vld [vmem:[#allocation7 + $0x4] sm:$0xf]  ;;  %v4147_v62 = vld [vmem:[#allocation7 + $0xc] sm:$0xf0] }
 0x1d8   : > { %2755 = vmatpush.bf16.msra.mxu1 %v4290_v20  ;;  %v4159_v20 = vld [vmem:[#allocation7 + $0x24] sm:$0xf0]  ;;  %v4270_v43 = vor.u32 %v4686_v45, %v4267_v49  ;;  %v4150_v3 = vor.u32 %v4656_v60, %v4147_v62  ;;  %v4670_v52 = vld [vmem:[#allocation7 + $0x70] sm:$0xf0]  ;;  %v4697_v58 = vld [vmem:[#allocation7 + $0x148] sm:$0xf0] }
 0x1d9   : > { %2308 = vmatmul.bf16.gmra.mxu0 %v2095_v54  ;;  %2346 = vmatmul.bf16.gmra.mxu2 %v2095_v54  ;;  %v4266_v54 = vor.u32 %v4687_v2, %v4265_v40  ;;  %v4162_v36 = vor.u32 %v4659_v44, %v4159_v20  ;;  %v4201_v18 = vld [vmem:[#allocation7 + $0x68] sm:$0xf]  ;;  %v4683_v40 = vld [vmem:[#allocation7 + $0xdc] sm:$0xf]  ;;  %v4680_v10 = vld [vmem:[#allocation7 + $0xc4] sm:$0xf] }
 0x1da   : > { %2744 = vmatpush.bf16.msra.mxu0 %v4170_v46  ;;  %2768 = vmatpush.bf16.msra.mxu2 %v4198_v39  ;;  %v4202_v39 = vor.u32 %v4670_v52, %v4201_v18  ;;  %v4255_v2 = vld [vmem:[#allocation7 + $0xe4] sm:$0xf0]  ;;  %v4694_v16 = vld [vmem:[#allocation7 + $0x130] sm:$0xf0]  ;;  %v4177_v19 = vld [vmem:[#allocation7 + $0x38] sm:$0xf] }
 0x1db   : > { %2781 = vmatpush.bf16.msra.mxu3 %v4294_v41  ;;  %v4258_v55 = vor.u32 %v4683_v40, %v4255_v2  ;;  %v4285_v28 = vld [vmem:[#allocation7 + $0x110] sm:$0xf]  ;;  %v4691_v29 = vld [vmem:[#allocation7 + $0x118] sm:$0xf0]  ;;  %v4661_v44 = vld [vmem:[#allocation7 + $0x28] sm:$0xf0] }
 0x1dc   : > { %2756 = vmatpush.bf16.msra.mxu1 %v4278_v22  ;;  %v4700_v22 = vld [vmem:[#allocation7 + $0x160] sm:$0xf0]  ;;  %v4273_v20 = vld [vmem:[#allocation7 + $0xf8] sm:$0xf]  ;;  %v4685_v60 = vld [vmem:[#allocation7 + $0xe8] sm:$0xf0] }
 0x1dd   : > { %v4322_v27 = vor.u32 %v4700_v22, %v4321_v42  ;;  %v4688_v8 = vld [vmem:[#allocation7 + $0x100] sm:$0xf0] }
 0x1de   : > { %2745 = vmatpush.bf16.msra.mxu0 %v4158_v1  ;;  %2769 = vmatpush.bf16.msra.mxu2 %v4186_v56  ;;  %v2131_v1 = vperm.slane %v2129_v50, 0  ;;  %v4274_v22 = vor.u32 %v4688_v8, %v4273_v20 }
 0x1df   : > { %2782 = vmatpush.bf16.msra.mxu3 %v4282_v34  ;;  %v4286_v34 = vor.u32 %v4691_v29, %v4285_v28 }
 0x1e0   : > { %2327 = vmatmul.bf16.gmra.mxu1 %v2096_v59  ;;  %2365 = vmatmul.bf16.gmra.mxu3 %v2096_v59  ;;  %v4146_v59 = vor.u32 %v4657_v24, %v4145_v57  ;;  %v4189_v24 = vld [vmem:[#allocation7 + $0x50] sm:$0xf] }
 0x1e1   : > { %2757 = vmatpush.bf16.msra.mxu1 %v4266_v54  ;;  %v4309_v54 = vld [vmem:[#allocation7 + $0x140] sm:$0xf] }
 0x1e2   : > { %2746 = vmatpush.bf16.msra.mxu0 %v4146_v59  ;;  %2770 = vmatpush.bf16.msra.mxu2 %v4174_v21  ;;  %v4310_v57 = vor.u32 %v4697_v58, %v4309_v54  ;;  %v4667_v59 = vld [vmem:[#allocation7 + $0x58] sm:$0xf0]  ;;  %v2132_v21 = vperm.slane %v2129_v50, 1 }
 0x1e3   : > { %2783 = vmatpush.bf16.msra.mxu3 %v4270_v43  ;;  %v4190_v53 = vor.u32 %v4667_v59, %v4189_v24 }
 0x1e5   : > { %2758 = vmatpush.bf16.msra.mxu1 %v4254_v26  ;;  %v4297_v26 = vld [vmem:[#allocation7 + $0x128] sm:$0xf] }
 0x1e6   : > { %2791 = vmatpush.bf16.msrb.mxu0 %v4238_v14  ;;  %2771 = vmatpush.bf16.msra.mxu2 %v4162_v36  ;;  %v4243_v14 = vld [vmem:[#allocation7 + $0xcc] sm:$0xf0] }
 0x1e7   : > { %2784 = vmatpush.bf16.msra.mxu3 %v4258_v55  ;;  %v4246_v41 = vor.u32 %v4680_v10, %v4243_v14 }
 0x1e9   : > { %2759 = vmatpush.bf16.msra.mxu1 %v4242_v33 }
 0x1ea   : > { %2792 = vmatpush.bf16.msrb.mxu0 %v4226_v25  ;;  %2772 = vmatpush.bf16.msra.mxu2 %v4150_v3 }
 0x1eb   : > { %2785 = vmatpush.bf16.msra.mxu3 %v4246_v41 }
 0x1ed   : > { %2804 = vmatpush.bf16.msrb.mxu1 %v4334_v7  ;;  %v4165_v7 = vld [vmem:[#allocation7 + $0x20] sm:$0xf] }
 0x1ee   : > { %2793 = vmatpush.bf16.msrb.mxu0 %v4214_v47  ;;  %v4166_v36 = vor.u32 %v4661_v44, %v4165_v7  ;;  %v4658_v47 = vld [vmem:[#allocation7 + $0x10] sm:$0xf0]  ;;  %v4725_v44 = vld [vmem:[#allocation8 + $0xac] sm:$0xf] }
 0x1ef   : > { %v4726_v7 = vld [vmem:[#allocation8 + $0xb0] sm:$0xf0] }
 0x1f1   : > { %2805 = vmatpush.bf16.msrb.mxu1 %v4322_v27  ;;  %v4261_v27 = vld [vmem:[#allocation7 + $0xe0] sm:$0xf] }
 0x1f2   : > { %2794 = vmatpush.bf16.msrb.mxu0 %v4202_v39  ;;  %v4262_v2 = vor.u32 %v4685_v60, %v4261_v27 }
 0x1f5   : > { %2806 = vmatpush.bf16.msrb.mxu1 %v4310_v57 }
 0x1f6   : > { %2795 = vmatpush.bf16.msrb.mxu0 %v4190_v53  ;;  %v4249_v53 = vld [vmem:[#allocation7 + $0xc8] sm:$0xf] }
 0x246   : > { %v5383_v51 = vpop.f32.mrf.mxu0 }
 0x247   : > { %v2305_v48 = vadd.f32 %v5383_v51, %v2131_v1  ;;  %v4298_v51 = vor.u32 %v4694_v16, %v4297_v26 }
 0x249   : > { %2807 = vmatpush.bf16.msrb.mxu1 %v4298_v51 }
 0x24c   : > { %v5385_v6 = vpop.f32.mrf.mxu2 }
 0x24d   : > { %v5387_v13 = vpop.f32.mrf.mxu1  ;;  %v2343_v61 = vadd.f32 %v5385_v6, %v2132_v21  ;;  %2808 = vmatpush.bf16.msrb.mxu1 %v4286_v34 }
 0x24e   : > { %v5389_v9 = vpop.f32.mrf.mxu0  ;;  %v2324_v15 = vadd.f32 %v5387_v13, %v2305_v48  ;;  %v5401_v13 = vpop.eup %4796 }
 0x24f   : > { %v2307_v4 = vadd.f32 %v5389_v9, %v2131_v1  ;;  %v4664_v9 = vld [vmem:[#allocation7 + $0x40] sm:$0xf0]  ;;  %vm2405_vm6 = vweird.f32 %v5401_v13 }
 0x250   : > { %v4178_v63 = vor.u32 %v4664_v9, %v4177_v19  ;;  %v2371_v30 = vmax.f32 %v2324_v15, 0.0 }
 0x251   : > { %2809 = vmatpush.bf16.msrb.mxu1 %v4274_v22  ;;  %v4419_v22 = vld [vmem:[#allocation8 + $0x98] sm:$0xf] }
 0x252   : > { %2796 = vmatpush.bf16.msrb.mxu0 %v4178_v63 }
 0x253   : > { %v5391_v38 = vpop.f32.mrf.mxu3 }
 0x254   : > { %v5396_v35 = vpop.f32.mrf.mxu2  ;;  %v2362_v62 = vadd.f32 %v5391_v38, %v2343_v61  ;;  %v4431_v61 = vld [vmem:[#allocation8 + $0xb0] sm:$0xf] }
 0x255   : > { %v2325_v46 = vpop.f32.mrf.mxu1  ;;  %v2345_v37 = vadd.f32 %v5396_v35, %v2132_v21  ;;  %v2401_v35 = vmul.f32 25.0, %v5401_v13  ;;  %2810 = vmatpush.bf16.msrb.mxu1 %v4262_v2 }
 0x256   : > { %v2309_v12 = vpop.f32.mrf.mxu0  ;;  %v2326_v5 = vadd.f32 %v2325_v46, %v2307_v4  ;;  %v4153_v46 = vld [vmem:[#allocation7 + $0x8] sm:$0xf]  ;;  %2797 = vmatpush.bf16.msrb.mxu0 %v4166_v36 }
 0x257   : > { %v2310_v17 = vadd.f32 %v2309_v12, %v2131_v1  ;;  %v4154_v3 = vor.u32 %v4658_v47, %v4153_v46  ;;  %v2402_v55 = vsub.f32 1.0, %v2401_v35  ;;  %v5416_v46 = vld [vmem:[%s5505_s8] sm:$0x7]  ;;  %v4411_v47 = vld [vmem:[#allocation8 + $0x90] sm:$0xf] }
 0x258   : > { %v2373_v33 = vmax.f32 %v2326_v5, 0.0  ;;  %v2733_v60 = vperm.slane %v5416_v46, 0 }
 0x25a   : > { %v2379_v6 = vadd.f32 %v2373_v33, %v2371_v30  ;;  %2798 = vmatpush.bf16.msrb.mxu0 %v4154_v3 }
 0x25b   : > { %v2363_v23 = vpop.f32.mrf.mxu3 }
 0x25c   : > { %v2347_v31 = vpop.f32.mrf.mxu2  ;;  %v2364_v45 = vadd.f32 %v2363_v23, %v2345_v37  ;;  %v2372_v23 = vmax.f32 %v2362_v62, 0.0 }
 0x25d   : > { %v2328_v56 = vpop.f32.mrf.mxu1  ;;  %v2348_v42 = vadd.f32 %v2347_v31, %v2132_v21  ;;  %v2403_v31 = vmul.f32 %v5401_v13, %v2402_v55  ;;  %v4387_v55 = vld [vmem:[#allocation8 + $0x60] sm:$0xf] }
 0x25e   : > { %v2329_v0 = vadd.f32 %v2328_v56, %v2310_v17  ;;  %v2311_v25 = vpop.f32.mrf.mxu0  ;;  %v2374_v39 = vmax.f32 %v2364_v45, 0.0  ;;  %v4682_v56 = vld [vmem:[#allocation7 + $0xd0] sm:$0xf0]  ;;  %v4723_v45 = vld [vmem:[#allocation8 + $0x98] sm:$0xf0] }
 0x25f   : > { %v2312_v50 = vadd.f32 %v2311_v25, %v2131_v1  ;;  %v4250_v10 = vor.u32 %v4682_v56, %v4249_v53  ;;  %v2404_v16 = vadd.f32 %v5401_v13, %v2403_v31 }
 0x260   : > { %v2375_v49 = vmax.f32 %v2329_v0, 0.0  ;;  %v2390_v48 = vadd.f32 %v2374_v39, %v2372_v23  ;;  %v4407_v39 = vld [vmem:[#allocation8 + $0x80] sm:$0xf]  ;;  %v4716_v23 = vld [vmem:[#allocation8 + $0x64] sm:$0xf] }
 0x261   : > { %2811 = vmatpush.bf16.msrb.mxu1 %v4250_v10 }
 0x262   : > { %v2380_v40 = vadd.f32 %v2379_v6, %v2375_v49  ;;  %v4722_v49 = vld [vmem:[#allocation8 + $0x94] sm:$0xf]  ;;  %v4399_v6 = vld [vmem:[#allocation8 + $0x78] sm:$0xf] }
 0x263   : > { %v2366_v11 = vpop.f32.mrf.mxu3 }
 0x264   : > { %v2367_v18 = vadd.f32 %v2366_v11, %v2348_v42  ;;  %v2349_v1 = vpop.f32.mrf.mxu2  ;;  %v4423_v11 = vld [vmem:[#allocation8 + $0xa8] sm:$0xf]  ;;  %v4412_v42 = vor.u32 %v4723_v45, %v4411_v47  ;;  %v4359_v45 = vld [vmem:[#allocation8 + $0x20] sm:$0xf] }
 0x265   : > { %v2330_v43 = vpop.f32.mrf.mxu1  ;;  %v2350_v58 = vadd.f32 %v2349_v1, %v2132_v21  ;;  %v2406_v21 = vsel %vm2405_vm6, %v5401_v13, %v2404_v16  ;;  %v4424_v20 = vor.u32 %v4726_v7, %v4423_v11  ;;  %v4425_v13 = vld [vmem:[#allocation8 + $0xb4] sm:$0xf0]  ;;  %v4719_v1 = vld [vmem:[#allocation8 + $0x7c] sm:$0xf]  ;;  %v4353_v47 = vld [vmem:[#allocation8 + $0x24] sm:$0xf0] }
 0x266   : > { %v2331_v12 = vadd.f32 %v2330_v43, %v2312_v50  ;;  %v2376_v57 = vmax.f32 %v2367_v18, 0.0  ;;  %v4727_v50 = vld [vmem:[#allocation8 + $0xb8] sm:$0xf0]  ;;  %v4428_v36 = vor.u32 %v4725_v44, %v4425_v13  ;;  %v4413_v43 = vld [vmem:[#allocation8 + $0x9c] sm:$0xf0]  ;;  %v2735_v44 = vperm.slane %v5416_v46, 2 }
 0x267   : > { %v4432_v8 = vor.u32 %v4727_v50, %v4431_v61  ;;  %3030 = vmatpush.bf16.msrb.mxu2 %v4424_v20  ;;  %v4416_v35 = vor.u32 %v4722_v49, %v4413_v43  ;;  %v4720_v18 = vld [vmem:[#allocation8 + $0x80] sm:$0xf0]  ;;  %v4377_v16 = vld [vmem:[#allocation8 + $0x54] sm:$0xf0]  ;;  %v4707_v50 = vld [vmem:[#allocation8 + $0x1c] sm:$0xf] }
 0x268   : > { %v2377_v52 = vmax.f32 %v2331_v12, 0.0  ;;  %v2391_v14 = vadd.f32 %v2390_v48, %v2376_v57  ;;  %3043 = vmatpush.bf16.msrb.mxu3 %v4428_v36  ;;  %v4724_v12 = vld [vmem:[#allocation8 + $0xa0] sm:$0xf0]  ;;  %v4400_v3 = vor.u32 %v4720_v18, %v4399_v6  ;;  %v4718_v48 = vld [vmem:[#allocation8 + $0x70] sm:$0xf0]  ;;  %v4356_v43 = vor.u32 %v4707_v50, %v4353_v47 }
 0x269   : > { %v4420_v27 = vor.u32 %v4724_v12, %v4419_v22  ;;  %v4351_v13 = vld [vmem:[#allocation8 + $0x18] sm:$0xf]  ;;  %v4708_v61 = vld [vmem:[#allocation8 + $0x20] sm:$0xf0]  ;;  %v4709_v49 = vld [vmem:[#allocation8 + $0x28] sm:$0xf0] }
 0x26a   : > { %v2382_v54 = vsel %vm2381_vm5, %v2377_v52, 0.0  ;;  %v4401_v52 = vld [vmem:[#allocation8 + $0x84] sm:$0xf0]  ;;  %v4360_v22 = vor.u32 %v4709_v49, %v4359_v45  ;;  %v4339_v12 = vld [vmem:[#allocation8] sm:$0xf]  ;;  %v2734_v18 = vperm.slane %v5416_v46, 1 }
 0x26b   : > { %v2383_v24 = vadd.f32 %v2382_v54, %v2380_v40  ;;  %v2368_v59 = vpop.f32.mrf.mxu3  ;;  %3031 = vmatpush.bf16.msrb.mxu2 %v4412_v42  ;;  %v4721_v40 = vld [vmem:[#allocation8 + $0x88] sm:$0xf0]  ;;  %v4404_v2 = vor.u32 %v4719_v1, %v4401_v52  ;;  %v4347_v6 = vld [vmem:[#allocation8 + $0x8] sm:$0xf] }
 0x26c   : > { %v2369_v38 = vadd.f32 %v2368_v59, %v2350_v58  ;;  %3044 = vmatpush.bf16.msrb.mxu3 %v4416_v35  ;;  %v4408_v54 = vor.u32 %v4721_v40, %v4407_v39  ;;  %v4717_v58 = vld [vmem:[#allocation8 + $0x68] sm:$0xf0]  ;;  %v4389_v59 = vld [vmem:[#allocation8 + $0x6c] sm:$0xf0] }
 0x26d   : > { %v2384_v4 = vrot.slane %v2383_v24, 4  ;;  %v4392_v56 = vor.u32 %v4716_v23, %v4389_v59  ;;  %v4705_v35 = vld [vmem:[#allocation8 + $0x8] sm:$0xf0] }
 0x26e   : > { %v2378_v32 = vmax.f32 %v2369_v38, 0.0  ;;  %v4395_v38 = vld [vmem:[#allocation8 + $0x68] sm:$0xf]  ;;  %v4730_v45 = vld [vmem:[%s5508_s11 + $0x10] sm:$0xff] }
 0x26f   : > { %v2385_v26 = vadd.f32 %v2384_v4, %v2383_v24  ;;  %3032 = vmatpush.bf16.msrb.mxu2 %v4400_v3  ;;  %v4388_v24 = vor.u32 %v4717_v58, %v4387_v55  ;;  %v4396_v31 = vor.u32 %v4718_v48, %v4395_v38  ;;  %v4706_v3 = vld [vmem:[#allocation8 + $0x10] sm:$0xf0] }
 0x270   : > { %v2392_v15 = vsel %vm2381_vm5, %v2378_v32, 0.0  ;;  %3045 = vmatpush.bf16.msrb.mxu3 %v4404_v2  ;;  %v4348_v40 = vor.u32 %v4706_v3, %v4347_v6 }
 0x271   : > { %v2386_v5 = vrot.slane %v2385_v26, 2  ;;  %v2393_v41 = vadd.f32 %v2392_v15, %v2391_v14  ;;  %v4375_v14 = vld [vmem:[#allocation8 + $0x48] sm:$0xf]  ;;  %v4713_v15 = vld [vmem:[#allocation8 + $0x4c] sm:$0xf] }
 0x273   : > { %v2387_v17 = vadd.f32 %v2386_v5, %v2385_v26  ;;  %v2394_v51 = vrot.slane %v2393_v41, 4  ;;  %3033 = vmatpush.bf16.msrb.mxu2 %v4388_v24  ;;  %v4714_v26 = vld [vmem:[#allocation8 + $0x50] sm:$0xf0] }
 0x274   : > { %3046 = vmatpush.bf16.msrb.mxu3 %v4392_v56 }
 0x275   : > { %v2388_v19 = vrot.slane %v2387_v17, 1  ;;  %v2395_v9 = vadd.f32 %v2394_v51, %v2393_v41  ;;  %v4376_v41 = vor.u32 %v4714_v26, %v4375_v14  ;;  %v4380_v51 = vor.u32 %v4713_v15, %v4377_v16 }
 0x277   : > { %v2389_v63 = vadd.f32 %v2388_v19, %v2387_v17  ;;  %v2396_v0 = vrot.slane %v2395_v9, 2  ;;  %v4383_v17 = vld [vmem:[#allocation8 + $0x50] sm:$0xf]  ;;  %v4715_v19 = vld [vmem:[#allocation8 + $0x58] sm:$0xf0]  ;;  %3034 = vmatpush.bf16.msrb.mxu2 %v4376_v41 }
 0x278   : > { %3047 = vmatpush.bf16.msrb.mxu3 %v4380_v51 }
 0x279   : > { %v2407_v25 = vmul.f32 %v2406_v21, %v2389_v63  ;;  %v2397_v28 = vadd.f32 %v2396_v0, %v2395_v9  ;;  %v4384_v9 = vor.u32 %v4715_v19, %v4383_v17  ;;  %v4363_v63 = vld [vmem:[#allocation8 + $0x30] sm:$0xf]  ;;  %v4711_v0 = vld [vmem:[#allocation8 + $0x38] sm:$0xf0] }
 0x27b   : > { %v2398_v29 = vrot.slane %v2397_v28, 1  ;;  %v2409_v30 = vpack.c.bf16 %v2407_v25, %v2407_v25  ;;  %v4710_v25 = vld [vmem:[#allocation8 + $0x34] sm:$0xf] }
 0x27d   : > { %v2399_v33 = vadd.f32 %v2398_v29, %v2397_v28  ;;  %2747 = vmatmul.bf16.vlgmr.msra.gmra.mxu0 %v2409_v30  ;;  %2773 = vmatmul.bf16.vlgmr.msra.gmra.mxu2 %v2409_v30  ;;  %v4364_v28 = vor.u32 %v4711_v0, %v4363_v63  ;;  %v4365_v29 = vld [vmem:[#allocation8 + $0x3c] sm:$0xf0] }
 0x27e   : > { %3056 = vmatpush.bf16.msra.mxu0 %v4432_v8  ;;  %v4368_v11 = vor.u32 %v4710_v25, %v4365_v29  ;;  %v4352_v8 = vor.u32 %v4708_v61, %v4351_v13  ;;  %v4731_v61 = vld [vmem:[%s5508_s11 + $0x18] sm:$0xff] }
 0x27f   : > { %v2408_v34 = vmul.f32 %v2406_v21, %v2399_v33  ;;  %v4712_v33 = vld [vmem:[#allocation8 + $0x40] sm:$0xf0]  ;;  %3035 = vmatpush.bf16.msrb.mxu2 %v4364_v28 }
 0x280   : > { %3048 = vmatpush.bf16.msrb.mxu3 %v4368_v11  ;;  %v2894_v11 = vld [vmem:[%s5507_s10] sm:$0x7] }
 0x281   : > { %v2410_v37 = vpack.c.bf16 %v2408_v34, %v2408_v34  ;;  %v3024_v50 = vperm.slane %v2894_v11, 0 }
 0x282   : > { %3057 = vmatpush.bf16.msra.mxu0 %v4420_v27  ;;  %v4340_v27 = vor.u32 %v4705_v35, %v4339_v12  ;;  %v4728_v35 = vld [vmem:[%s5508_s11] sm:$0xff] }
 0x283   : > { %2760 = vmatmul.bf16.vlgmr.msra.gmra.mxu1 %v2410_v37  ;;  %2786 = vmatmul.bf16.vlgmr.msra.gmra.mxu3 %v2410_v37 }
 0x284   : > { %3036 = vmatpush.bf16.msrb.mxu2 %v4352_v8  ;;  %3049 = vmatpush.bf16.msrb.mxu3 %v4356_v43 }
 0x286   : > { %3058 = vmatpush.bf16.msra.mxu0 %v4408_v54 }
 0x288   : > { %3037 = vmatpush.bf16.msrb.mxu2 %v4340_v27 }
 0x28a   : > { %3059 = vmatpush.bf16.msra.mxu0 %v4396_v31 }
 0x28d   : > { %2799 = vmatmul.bf16.vlgmr.msrb.gmra.mxu0 %v2409_v30  ;;  %v4371_v30 = vld [vmem:[#allocation8 + $0x38] sm:$0xf] }
 0x28e   : > { %3060 = vmatpush.bf16.msra.mxu0 %v4384_v9  ;;  %v4372_v7 = vor.u32 %v4712_v33, %v4371_v30  ;;  %v4735_v33 = vld [vmem:[%s5508_s11 + $0x38] sm:$0xff] }
 0x28f   : > { %3179 = vmatpush.bf16.msra.mxu1 %v4735_v33 }
 0x292   : > { %3061 = vmatpush.bf16.msra.mxu0 %v4372_v7  ;;  %v3026_v7 = vperm.slane %v2894_v11, 2 }
 0x293   : > { %2812 = vmatmul.bf16.vlgmr.msrb.gmra.mxu1 %v2410_v37 }
 0x296   : > { %3062 = vmatpush.bf16.msra.mxu0 %v4360_v22 }
 0x29a   : > { %3063 = vmatpush.bf16.msra.mxu0 %v4348_v40 }
 0x2fa   : > { %v2748_v62 = vpop.f32.mrf.mxu0 }
 0x2fb   : > { %v2749_v57 = vadd.f32 %v2748_v62, %v2733_v60  ;;  %v4704_v60 = vld [vmem:[#allocation8 + $0x4] sm:$0xf]  ;;  %v4341_v62 = vld [vmem:[#allocation8 + $0xc] sm:$0xf0] }
 0x2fc   : > { %v4344_v39 = vor.u32 %v4704_v60, %v4341_v62 }
 0x2fe   : > { %3050 = vmatpush.bf16.msrb.mxu3 %v4344_v39 }
 0x300   : > { %v2761_v4 = vpop.f32.mrf.mxu1  ;;  %v5419_v53 = vpop.f32.mrf.mxu2 }
 0x301   : > { %v2762_v32 = vadd.f32 %v2761_v4, %v2749_v57  ;;  %v2775_v55 = vadd.f32 %v5419_v53, %v2734_v18 }
 0x302   : > { %v2750_v10 = vpop.f32.mrf.mxu0 }
 0x303   : > { %v4335_v5 = vmul.f32 -1.442695, %v2762_v32 }
 0x305   : > { %4798 = vpow2.f32 %v4335_v5 }
 0x306   : > { %v2787_v21 = vpop.f32.mrf.mxu3 }
 0x307   : > { %v2788_v24 = vadd.f32 %v2787_v21, %v2775_v55 }
 0x308   : > { %v2763_v34 = vpop.f32.mrf.mxu1  ;;  %v2776_v37 = vpop.f32.mrf.mxu2 }
 0x309   : > { %v4734_v34 = vld [vmem:[%s5508_s11 + $0x30] sm:$0xff]  ;;  %v4733_v37 = vld [vmem:[%s5508_s11 + $0x28] sm:$0xff] }
 0x30a   : > { %v2800_v20 = vpop.f32.mrf.mxu0  ;;  %3180 = vmatpush.bf16.msra.mxu1 %v4734_v34 }
 0x30b   : > { %v4799_v36 = vpop.eup %4798  ;;  %v2801_v52 = vadd.f32 %v2800_v20, %v2735_v44  ;;  %v4732_v44 = vld [vmem:[%s5508_s11 + $0x20] sm:$0xff] }
 0x30c   : > { %v2820_v42 = vadd.f32 1.0, %v4799_v36 }
 0x30e   : > { %4800 = vrcp.f32 %v2820_v42  ;;  %v2789_v1 = vpop.f32.mrf.mxu3  ;;  %v2832_v38 = vand.u32 2147483648, %v2820_v42  ;;  %v2830_v56 = vand.u32 2147483647, %v2820_v42  ;;  %vm2826_vm8 = vweird.f32 %v2820_v42  ;;  %3181 = vmatpush.bf16.msra.mxu1 %v4733_v37 }
 0x30f   : > { %v3025_v1 = vperm.slane %v2894_v11, 1 }
 0x310   : > { %v2813_v2 = vpop.f32.mrf.mxu1  ;;  %v2833_v32 = vor.u32 1.1754944e-38, %v2832_v38  ;;  %vm2831_vm10 = vcmp.eq.f32.partialorder %v2830_v56, 8.507059e+37 }
 0x311   : > { %v2814_v54 = vadd.f32 %v2813_v2, %v2801_v52 }
 0x312   : > { %v2802_v58 = vpop.f32.mrf.mxu0  ;;  %3182 = vmatpush.bf16.msra.mxu1 %v4732_v44 }
 0x313   : > { %v4336_v23 = vmul.f32 -1.442695, %v2814_v54 }
 0x314   : > { %v4801_v57 = vpop.eup %4800 }
 0x315   : > { %v2822_v46 = vmul.f32 %v4801_v57, %v2820_v42  ;;  %4802 = vpow2.f32 %v4336_v23  ;;  %vm2827_vm7 = vweird.f32 %v4801_v57  ;;  %v4729_v42 = vld [vmem:[%s5508_s11 + $0x8] sm:$0xff] }
 0x316   : > { %4804 = vtanh.f32 %v2788_v24  ;;  %vm2828_vm9 = vmor %vm2826_vm8, %vm2827_vm7  ;;  %3183 = vmatpush.bf16.msra.mxu1 %v4731_v61  ;;  %v4739_v61 = vld [vmem:[%s5536_s26 + $0x8] sm:$0xff] }
 0x317   : > { %v2823_v59 = vsub.f32 1.0, %v2822_v46  ;;  %3292 = vmatpush.bf16.msra.mxu3 %v4739_v61 }
 0x318   : > { %v2815_v48 = vpop.f32.mrf.mxu1 }
 0x319   : > { %v2824_v4 = vmul.f32 %v4801_v57, %v2823_v59 }
 0x31a   : > { %3184 = vmatpush.bf16.msra.mxu1 %v4730_v45 }
 0x31b   : > { %v4803_v31 = vpop.eup %4802  ;;  %v2825_v53 = vadd.f32 %v4801_v57, %v2824_v4 }
 0x31c   : > { %v2840_v10 = vadd.f32 1.0, %v4803_v31  ;;  %v4805_v26 = vpop.eup %4804 }
 0x31d   : > { %v2829_v14 = vsel %vm2828_vm9, %v4801_v57, %v2825_v53 }
 0x31e   : > { %v2834_v15 = vsel %vm2831_vm10, %v2833_v32, %v2829_v14  ;;  %4806 = vrcp.f32 %v2840_v10  ;;  %v2852_v51 = vand.u32 2147483648, %v2840_v10  ;;  %v2850_v9 = vand.u32 2147483647, %v2840_v10  ;;  %3185 = vmatpush.bf16.msra.mxu1 %v4729_v42 }
 0x31f   : > { %v2856_v5 = vmul.f32 %v4805_v26, %v2834_v15  ;;  %vm2846_vm12 = vweird.f32 %v2840_v10 }
 0x320   : > { %v2853_v63 = vor.u32 1.1754944e-38, %v2852_v51  ;;  %vm2851_vm14 = vcmp.eq.f32.partialorder %v2850_v9, 8.507059e+37  ;;  %v3130_v51 = vld [vmem:[%s5509_s12] sm:$0x1] }
 0x321   : > { %2860 = vst [vmem:[%s5430_s5] sm:$0x1] %v2856_v5  ;;  %4808 = vtanh.f32 %v2856_v5 }
 0x322   : > { %3186 = vmatpush.bf16.msra.mxu1 %v4728_v35 }
 0x324   : > { %v4807_v41 = vpop.eup %4806 }
 0x325   : > { %v2842_v16 = vmul.f32 %v4807_v41, %v2840_v10  ;;  %vm2847_vm11 = vweird.f32 %v4807_v41 }
 0x326   : > { %vm2848_vm13 = vmor %vm2846_vm12, %vm2847_vm11  ;;  %vm3229_vm11 = vcmask 261120  }
 0x327   : > { %v2843_v17 = vsub.f32 1.0, %v2842_v16  ;;  %v4809_v25 = vpop.eup %4808  ;;  %v4737_v16 = vld [vmem:[%s5510_s13 + $0x8] sm:$0xff] }
 0x328   : > { %3239 = vmatpush.bf16.msra.mxu2 %v4737_v16 }
 0x329   : > { %v2844_v19 = vmul.f32 %v4807_v41, %v2843_v17  ;;  %v4736_v17 = vld [vmem:[%s5510_s13] sm:$0xff] }
 0x32b   : > { %v2845_v21 = vadd.f32 %v4807_v41, %v2844_v19 }
 0x32c   : > { %3240 = vmatpush.bf16.msra.mxu2 %v4736_v17 }
 0x32d   : > { %v2849_v0 = vsel %vm2848_vm13, %v4807_v41, %v2845_v21 }
 0x32e   : > { %v2854_v28 = vsel %vm2851_vm14, %v2853_v63, %v2849_v0 }
 0x32f   : > { %v2858_v29 = vmul.f32 %v4809_v25, %v2854_v28 }
 0x331   : > { %2859 = vst [vmem:[%s5438_s2] sm:$0x1] %v2858_v29  ;;  %v2861_v30 = vpack.c.bf16 %v2858_v29, %v2858_v29 }
 0x333   : > { %3038 = vmatmul.bf16.vlgmr.msrb.gmra.mxu2 %v2861_v30  ;;  %3051 = vmatmul.bf16.vlgmr.msrb.gmra.mxu3 %v2861_v30 }
 0x334   : > { %3064 = vmatmul.bf16.vlgmr.msra.gmra.mxu0 %v2861_v30 }
 0x3b1   : > { %v3065_v20 = vpop.f32.mrf.mxu0 }
 0x3b2   : > { %v3066_v13 = vadd.f32 %v3065_v20, %v3026_v7 }
 0x3b4   : > { %v4434_v36 = vmul.f32 -1.442695, %v3066_v13 }
 0x3b6   : > { %4810 = vpow2.f32 %v4434_v36  ;;  %v3039_v8 = vpop.f32.mrf.mxu2  ;;  %v3052_v47 = vpop.f32.mrf.mxu3  ;;  %v3216_v36 = vld [vmem:[%s5537_s14] sm:$0x1] }
 0x3b7   : > { %v3040_v49 = vadd.f32 %v3039_v8, %v3024_v50  ;;  %v3053_v40 = vadd.f32 %v3052_v47, %v3025_v1  ;;  %v4738_v50 = vld [vmem:[%s5536_s26] sm:$0xff] }
 0x3b8   : > { %3293 = vmatpush.bf16.msra.mxu3 %v4738_v50 }
 0x3b9   : > { %v4433_v43 = vmul.f32 -1.442695, %v3040_v49  ;;  %v3067_v22 = vpop.f32.mrf.mxu0 }
 0x3bb   : > { %4812 = vpow2.f32 %v4433_v43 }
 0x3bc   : > { %v4811_v12 = vpop.eup %4810 }
 0x3bd   : > { %v3092_v27 = vadd.f32 1.0, %v4811_v12 }
 0x3be   : > { %v3041_v60 = vpop.f32.mrf.mxu2  ;;  %v3054_v62 = vpop.f32.mrf.mxu3 }
 0x3bf   : > { %4814 = vrcp.f32 %v3092_v27  ;;  %v3104_v53 = vand.u32 2147483648, %v3092_v27  ;;  %vm3098_vm4 = vweird.f32 %v3092_v27  ;;  %v3102_v32 = vand.u32 2147483647, %v3092_v27 }
 0x3c1   : > { %v4813_v6 = vpop.eup %4812  ;;  %v3105_v14 = vor.u32 1.1754944e-38, %v3104_v53  ;;  %vm3103_vm6 = vcmp.eq.f32.partialorder %v3102_v32, 8.507059e+37 }
 0x3c2   : > { %v3072_v18 = vadd.f32 1.0, %v4813_v6 }
 0x3c4   : > { %4816 = vrcp.f32 %v3072_v18  ;;  %v3084_v58 = vand.u32 2147483648, %v3072_v18  ;;  %v3082_v57 = vand.u32 2147483647, %v3072_v18  ;;  %vm3078_vm0 = vweird.f32 %v3072_v18 }
 0x3c5   : > { %v4815_v3 = vpop.eup %4814  ;;  %4818 = vtanh.f32 %v3053_v40 }
 0x3c6   : > { %v3094_v39 = vmul.f32 %v4815_v3, %v3092_v27  ;;  %v3085_v59 = vor.u32 1.1754944e-38, %v3084_v58  ;;  %vm3083_vm2 = vcmp.eq.f32.partialorder %v3082_v57, 8.507059e+37  ;;  %vm3099_vm3 = vweird.f32 %v4815_v3 }
 0x3c7   : > { %vm3100_vm5 = vmor %vm3098_vm4, %vm3099_vm3 }
 0x3c8   : > { %v3095_v55 = vsub.f32 1.0, %v3094_v39  ;;  %v3270_v39 = vld [vmem:[#allocation2] sm:$0x1] }
 0x3ca   : > { %v4817_v52 = vpop.eup %4816  ;;  %v3096_v46 = vmul.f32 %v4815_v3, %v3095_v55 }
 0x3cb   : > { %v3074_v2 = vmul.f32 %v4817_v52, %v3072_v18  ;;  %vm3079_vm15 = vweird.f32 %v4817_v52  ;;  %v4819_v48 = vpop.eup %4818 }
 0x3cc   : > { %vm3080_vm1 = vmor %vm3078_vm0, %vm3079_vm15  ;;  %v3097_v31 = vadd.f32 %v4815_v3, %v3096_v46  ;;  %vm3299_vm0 = vcmask 0  }
 0x3cd   : > { %v3075_v54 = vsub.f32 1.0, %v3074_v2 }
 0x3ce   : > { %v3101_v10 = vsel %vm3100_vm5, %v4815_v3, %v3097_v31 }
 0x3cf   : > { %v3076_v23 = vmul.f32 %v4817_v52, %v3075_v54  ;;  %v3106_v15 = vsel %vm3103_vm6, %v3105_v14, %v3101_v10 }
 0x3d1   : > { %v3077_v24 = vadd.f32 %v4817_v52, %v3076_v23 }
 0x3d3   : > { %v3081_v38 = vsel %vm3080_vm1, %v4817_v52, %v3077_v24 }
 0x3d4   : > { %v3086_v4 = vsel %vm3083_vm2, %v3085_v59, %v3081_v38 }
 0x3d5   : > { %v3108_v56 = vmul.f32 %v4819_v48, %v3086_v4 }
 0x3d7   : > { %4820 = vtanh.f32 %v3108_v56  ;;  %3112 = vst [vmem:[%s5430_s5 + $0x1] sm:$0x1] %v3108_v56 }
 0x3dd   : > { %v4821_v26 = vpop.eup %4820 }
 0x3de   : > { %v3110_v5 = vmul.f32 %v4821_v26, %v3106_v15 }
 0x3e0   : > { %3111 = vst [vmem:[%s5438_s2 + $0x1] sm:$0x1] %v3110_v5  ;;  %v3113_v41 = vpack.c.bf16 %v3110_v5, %v3110_v5 }
 0x3e2   : > { %3187 = vmatmul.bf16.vlgmr.msra.gmra.mxu1 %v3113_v41 }
 0x45f   : > { %v3188_v19 = vpop.f32.mrf.mxu1 }
 0x460   : > { %v3189_v9 = vadd.f32 %v3188_v19, %v3130_v51 }
 0x462   : > { %v4467_v21 = vmul.f32 -1.442695, %v3189_v9 }
 0x464   : > { %4822 = vpow2.f32 %v4467_v21 }
 0x467   : > { %v3190_v63 = vpop.f32.mrf.mxu1 }
 0x46a   : > { %v4823_v0 = vpop.eup %4822 }
 0x46b   : > { %v3195_v25 = vadd.f32 1.0, %v4823_v0 }
 0x46d   : > { %4824 = vrcp.f32 %v3195_v25  ;;  %v3207_v33 = vand.u32 2147483648, %v3195_v25  ;;  %v3205_v37 = vand.u32 2147483647, %v3195_v25  ;;  %vm3201_vm8 = vweird.f32 %v3195_v25 }
 0x46f   : > { %v3208_v7 = vor.u32 1.1754944e-38, %v3207_v33  ;;  %vm3206_vm10 = vcmp.eq.f32.partialorder %v3205_v37, 8.507059e+37 }
 0x473   : > { %v4825_v28 = vpop.eup %4824 }
 0x474   : > { %v3197_v29 = vmul.f32 %v4825_v28, %v3195_v25  ;;  %vm3202_vm7 = vweird.f32 %v4825_v28 }
 0x475   : > { %vm3203_vm9 = vmor %vm3201_vm8, %vm3202_vm7 }
 0x476   : > { %v3198_v30 = vsub.f32 1.0, %v3197_v29 }
 0x478   : > { %v3199_v34 = vmul.f32 %v4825_v28, %v3198_v30 }
 0x47a   : > { %v3200_v11 = vadd.f32 %v4825_v28, %v3199_v34 }
 0x47c   : > { %v3204_v44 = vsel %vm3203_vm9, %v4825_v28, %v3200_v11 }
 0x47d   : > { %v3209_v20 = vsel %vm3206_vm10, %v3208_v7, %v3204_v44 }
 0x47e   : > { %v3211_v13 = vpack.c.bf16 %v3209_v20, %v3209_v20 }
 0x480   : > { %4476 = vmatmul.msk.bf16.vlgmr.msra.gmra.mxu2 %vm3229_vm11, %v3211_v13 }
 0x503   : > { %v3242_v8 = vpop.f32.mrf.mxu2 }
 0x504   : > { %v3243_v47 = vadd.f32 %v3242_v8, %v3216_v36 }
 0x506   : > { %v4477_v45 = vmul.f32 -1.442695, %v3243_v47 }
 0x508   : > { %4826 = vpow2.f32 %v4477_v45 }
 0x50b   : > { %v3244_v49 = vpop.f32.mrf.mxu2 }
 0x50e   : > { %v4827_v42 = vpop.eup %4826 }
 0x50f   : > { %v3249_v43 = vadd.f32 1.0, %v4827_v42 }
 0x511   : > { %4828 = vrcp.f32 %v3249_v43  ;;  %v3261_v27 = vand.u32 2147483648, %v3249_v43  ;;  %v3259_v62 = vand.u32 2147483647, %v3249_v43  ;;  %vm3255_vm13 = vweird.f32 %v3249_v43 }
 0x513   : > { %v3262_v18 = vor.u32 1.1754944e-38, %v3261_v27  ;;  %vm3260_vm15 = vcmp.eq.f32.partialorder %v3259_v62, 8.507059e+37 }
 0x517   : > { %v4829_v22 = vpop.eup %4828 }
 0x518   : > { %v3251_v12 = vmul.f32 %v4829_v22, %v3249_v43  ;;  %vm3256_vm12 = vweird.f32 %v4829_v22 }
 0x519   : > { %vm3257_vm14 = vmor %vm3255_vm13, %vm3256_vm12 }
 0x51a   : > { %v3252_v35 = vsub.f32 1.0, %v3251_v12 }
 0x51c   : > { %v3253_v60 = vmul.f32 %v4829_v22, %v3252_v35 }
 0x51e   : > { %v3254_v6 = vadd.f32 %v4829_v22, %v3253_v60 }
 0x520   : > { %v3258_v1 = vsel %vm3257_vm14, %v4829_v22, %v3254_v6 }
 0x521   : > { %v3263_v3 = vsel %vm3260_vm15, %v3262_v18, %v3258_v1 }
 0x522   : > { %v3265_v52 = vpack.c.bf16 %v3263_v3, %v3263_v3 }
 0x524   : > { %4486 = vmatmul.msk.bf16.vlgmr.msra.gmra.mxu3 %vm3229_vm11, %v3265_v52 }
 0x5a7   : > { %v3295_v40 = vpop.f32.mrf.mxu3 }
 0x5a8   : > { %v3296_v2 = vadd.f32 %v3295_v40, %v3270_v39 }
 0x5aa   : > { %3300 = vst.msk [vmem:[%s680_s28] sm:$0x1] %vm3299_vm0, %v3296_v2 }
 0x5af   : > { %v3297_v54 = vpop.f32.mrf.mxu3 }
 0x5b0 PF: > { %s5539_s0 = sld [smem:[#allocation13_spill]] }
 0x5b6   : > { %s35_s20 = sadd.s32 1, %s5539_s0  }
 0x5b7   : > { %p32_p7 = scmp.ge.s32.totalorder %s35_s20, 4  }
 0x5b9   :  { %34 = sbr.rel (!%p32_p7) target bundleno = 12 (0xc), region = 160 }
 0x5be   :  { %3346 = vsyncpa [#allocation4], 1 }
 0x5bf   :  { %3348 = vsyncpa [#allocation4 + $0x1], 1 }
 0x5c0   :  { %3349 = vsyncpa [#allocation6], 1 }
 0x5c1   :  { %3350 = vsyncpa [#allocation9], 1 }

</bundles_post_ra>
